<compile_context>
chip_gen: v6e
topology: v6e:2x2x1
jax: 0.10.0
libtpu: 0.0.40
codegen_flags: <defaults>
</compile_context>

<pallas_src>
import jax
import jax.numpy as jnp
from jax import lax
from jax.experimental import pallas as pl
from jax.experimental.pallas import tpu as pltpu

# ---- small, module-consistent config (Config scaled down) ----
D_MODEL = 32
N_HEADS = 4
HEAD_DIM = D_MODEL // N_HEADS
INT_DIM = 64
N_LAYERS = 2
BATCH = 2
SEQ = 8
LN_EPS = 1e-5
NEG_BIG = -1e30  # additive key mask (finite => no inf-inf NaN)

# ---- packed-slab row layout ----
WSLAB_COLS = 3 * D_MODEL          # 96 (widest weight: fused QKV)
R_WQKV = 0                        # (D, 3D)
R_WO = R_WQKV + D_MODEL           # (D, D)
R_W1 = R_WO + D_MODEL             # (D, INT)
R_W2 = R_W1 + D_MODEL             # (INT, D)
WSLAB_ROWS = R_W2 + INT_DIM       # 160

P_BQKV, P_BO, P_G1, P_BE1, P_B1, P_B2, P_G2, P_BE2 = range(8)
PSLAB_ROWS = 8


def encoder_kernel(bias_ref, x_ref, w_ref, p_ref, out_ref):
    x = x_ref[...]                 # (B*T, D) f32 residual stream, stays resident
    bias = bias_ref[...]           # (B*T, B*T) additive mask: 0 or -1e30

    for l in range(N_LAYERS):      # unrolled: no HBM round-trips between layers
        # ---- static views into the packed parameter slabs ----
        wqkv = w_ref[l, R_WQKV:R_WQKV + D_MODEL, :]              # (D, 3D) bf16
        wo = w_ref[l, R_WO:R_WO + D_MODEL, 0:D_MODEL]            # (D, D)  bf16
        w1 = w_ref[l, R_W1:R_W1 + D_MODEL, 0:INT_DIM]            # (D, F)  bf16
        w2 = w_ref[l, R_W2:R_W2 + INT_DIM, 0:D_MODEL]            # (F, D)  bf16

        bqkv = p_ref[l, P_BQKV:P_BQKV + 1, :]                    # (1, 3D) f32
        bo = p_ref[l, P_BO:P_BO + 1, 0:D_MODEL]
        g1 = p_ref[l, P_G1:P_G1 + 1, 0:D_MODEL]
        be1 = p_ref[l, P_BE1:P_BE1 + 1, 0:D_MODEL]
        b1 = p_ref[l, P_B1:P_B1 + 1, 0:INT_DIM]
        b2 = p_ref[l, P_B2:P_B2 + 1, 0:D_MODEL]
        g2 = p_ref[l, P_G2:P_G2 + 1, 0:D_MODEL]
        be2 = p_ref[l, P_BE2:P_BE2 + 1, 0:D_MODEL]

        # ---- fused QKV projection: one MXU push, M = B*T ----
        # (1/sqrt(head_dim) is folded into the Q columns/bias at init)
        qkv = jnp.dot(x.astype(jnp.bfloat16), wqkv,
                      preferred_element_type=jnp.float32) + bqkv      # (BT, 3D) f32

        # ---- attention: per head over the whole batch, block-diag masked ----
        heads = []
        for h in range(N_HEADS):
            lo = h * HEAD_DIM
            qh = qkv[:, lo:lo + HEAD_DIM].astype(jnp.bfloat16)                 # (BT, hd)
            kh = qkv[:, D_MODEL + lo:D_MODEL + lo + HEAD_DIM].astype(jnp.bfloat16)
            vh = qkv[:, 2 * D_MODEL + lo:2 * D_MODEL + lo + HEAD_DIM].astype(jnp.bfloat16)

            # q @ k^T without an explicit transpose
            s = lax.dot_general(qh, kh, (((1,), (1,)), ((), ())),
                                preferred_element_type=jnp.float32) + bias     # (BT, BT)
            m = jnp.max(s, axis=-1, keepdims=True)
            p = jnp.exp(s - m)
            # approx reciprocal (EUP slot, ~free); use approx=False for exact
            # torch-softmax parity.
            inv = pl.reciprocal(jnp.sum(p, axis=-1, keepdims=True), approx=True)
            heads.append(jnp.dot((p * inv).astype(jnp.bfloat16), vh,
                                 preferred_element_type=jnp.float32))          # (BT, hd)

        # concat head outputs in vregs (no scratch) -> single Wo matmul
        attn_cat = jnp.concatenate(heads, axis=-1).astype(jnp.bfloat16)        # (BT, D)
        attn_out = jnp.dot(attn_cat, wo, preferred_element_type=jnp.float32) + bo

        # ---- residual + LayerNorm 1 (f32) ----
        y = x + attn_out
        mu = jnp.mean(y, axis=-1, keepdims=True)
        yc = y - mu
        var = jnp.mean(yc * yc, axis=-1, keepdims=True)
        y = yc * lax.rsqrt(var + LN_EPS) * g1 + be1

        # ---- FFN ----
        h1 = jnp.dot(y.astype(jnp.bfloat16), w1,
                     preferred_element_type=jnp.float32) + b1
        h1 = jnp.maximum(h1, 0.0)
        ff = jnp.dot(h1.astype(jnp.bfloat16), w2,
                     preferred_element_type=jnp.float32) + b2

        # ---- residual + LayerNorm 2 (f32) ----
        z = y + ff
        mu2 = jnp.mean(z, axis=-1, keepdims=True)
        zc = z - mu2
        var2 = jnp.mean(zc * zc, axis=-1, keepdims=True)
        x = zc * lax.rsqrt(var2 + LN_EPS) * g2 + be2

    out_ref[...] = x               # single lane-dense (B*T, D) store


def build_attn_bias(pad_mask, batch, seq):
    """Additive (B*T, B*T) bias: -1e30 for cross-batch keys and padded keys.

    Accepts bool (torch convention, True = pad) or float (1.0 = pad) masks.
    """
    pm = pad_mask.astype(jnp.float32)                       # (B, T)
    same = jnp.eye(batch, dtype=jnp.float32)                # (B, B)
    # masked[bq, bk, tk] = 1 if key (bk, tk) must be hidden from queries in bq
    masked = (1.0 - same)[:, :, None] + same[:, :, None] * pm[None, :, :]
    bias = masked * NEG_BIG                                 # (B, B, T)
    bias = jnp.broadcast_to(bias[:, None, :, :], (batch, seq, batch, seq))
    return bias.reshape(batch * seq, batch * seq)


@jax.jit
def encoder_forward(x, src_key_padding_mask, w_slab, p_slab):
    B, T, D = x.shape
    bias = build_attn_bias(src_key_padding_mask, B, T)
    x2d = x.reshape(B * T, D)

    out2d = pl.pallas_call(
        encoder_kernel,
        out_shape=jax.ShapeDtypeStruct((B * T, D), jnp.float32),
        # gridless call: every operand is one whole-array VMEM block,
        # no per-step pipelining / double buffering to pay for.
        in_specs=[pl.BlockSpec(memory_space=pltpu.MemorySpace.VMEM)] * 4,
        out_specs=pl.BlockSpec(memory_space=pltpu.MemorySpace.VMEM),
    )(bias, x2d, w_slab, p_slab)

    return out2d.reshape(B, T, D)


def init_layer_params(key):
    ks = jax.random.split(key, 6)

    def lin(k, fan_in, fan_out):
        bound = 1.0 / (fan_in ** 0.5)
        kw, kb = jax.random.split(k)
        w = jax.random.uniform(kw, (fan_in, fan_out), jnp.float32, -bound, bound)
        b = jax.random.uniform(kb, (fan_out,), jnp.float32, -bound, bound)
        return w, b

    wq, bq = lin(ks[0], D_MODEL, D_MODEL)
    wk, bk = lin(ks[1], D_MODEL, D_MODEL)
    wv, bv = lin(ks[2], D_MODEL, D_MODEL)
    wo, bo = lin(ks[3], D_MODEL, D_MODEL)

    # fold the 1/sqrt(head_dim) attention scale into the Q projection
    scale = 1.0 / (HEAD_DIM ** 0.5)
    wq = wq * scale
    bq = bq * scale

    wqkv = jnp.concatenate([wq, wk, wv], axis=1)            # (D, 3D)
    bqkv = jnp.concatenate([bq, bk, bv], axis=0)            # (3D,)

    w1, b1 = lin(ks[4], D_MODEL, INT_DIM)
    w2, b2 = lin(ks[5], INT_DIM, D_MODEL)
    g1 = jnp.ones((D_MODEL,), jnp.float32)
    be1 = jnp.zeros((D_MODEL,), jnp.float32)
    g2 = jnp.ones((D_MODEL,), jnp.float32)
    be2 = jnp.zeros((D_MODEL,), jnp.float32)
    return dict(wqkv=wqkv, bqkv=bqkv, wo=wo, bo=bo, w1=w1, b1=b1, w2=w2, b2=b2,
                g1=g1, be1=be1, g2=g2, be2=be2)


def pack_layer(p):
    def padc(a):  # pad columns to the slab width
        return jnp.pad(a, ((0, 0), (0, WSLAB_COLS - a.shape[1])))

    w = jnp.concatenate(
        [padc(p["wqkv"]), padc(p["wo"]), padc(p["w1"]), padc(p["w2"])],
        axis=0)                                             # (WSLAB_ROWS, 96)

    def row(v):
        return jnp.pad(v, (0, WSLAB_COLS - v.shape[0]))[None, :]

    pr = jnp.concatenate(
        [row(p["bqkv"]), row(p["bo"]), row(p["g1"]), row(p["be1"]),
         row(p["b1"]), row(p["b2"]), row(p["g2"]), row(p["be2"])],
        axis=0)                                             # (8, 96)
    return w, pr


def init_stacked_params(key):
    layers = [init_layer_params(k) for k in jax.random.split(key, N_LAYERS)]
    packed = [pack_layer(p) for p in layers]
    w_slab = jnp.stack([w for w, _ in packed]).astype(jnp.bfloat16)  # (L, 160, 96) bf16
    p_slab = jnp.stack([pr for _, pr in packed])                     # (L, 8, 96)  f32
    return w_slab, p_slab


if __name__ == "__main__":
    key = jax.random.PRNGKey(0)
    k_x, k_p = jax.random.split(key)

    x = jax.random.normal(k_x, (BATCH, SEQ, D_MODEL), jnp.float32)

    # torch-style bool key-padding mask (True = padded key); wrapper converts.
    pad_mask = jnp.zeros((BATCH, SEQ), jnp.bool_)
    pad_mask = pad_mask.at[0, SEQ - 2:].set(True)
    pad_mask = pad_mask.at[1, SEQ - 3:].set(True)

    w_slab, p_slab = init_stacked_params(k_p)

    out = encoder_forward(x, pad_mask, w_slab, p_slab)
    jax.block_until_ready(out)
    assert out.shape == (BATCH, SEQ, D_MODEL)
    assert bool(jnp.all(jnp.isfinite(out)))
    print("KERNEL_OK")
</pallas_src>

<mosaic_0001>
module attributes {stable_mosaic.version = 11 : i64} {
  func.func @encoder_kernel(%arg0: memref<16x16xf32, #tpu.memory_space<vmem>>, %arg1: memref<16x32xf32, #tpu.memory_space<vmem>>, %arg2: memref<2x160x96xbf16, #tpu.memory_space<vmem>>, %arg3: memref<2x8x96xf32, #tpu.memory_space<vmem>>, %arg4: memref<16x32xf32, #tpu.memory_space<vmem>>) attributes {dimension_semantics = [], scalar_prefetch = 0 : i64, scratch_operands = 0 : i64, tpu.core_type = #tpu.core_type<tc>} {
    %c0 = arith.constant 0 : index
    %c0_0 = arith.constant 0 : index
    %0 = vector.load %arg1[%c0, %c0_0] : memref<16x32xf32, #tpu.memory_space<vmem>>, vector<16x32xf32>
    %c0_1 = arith.constant 0 : index
    %c0_2 = arith.constant 0 : index
    %1 = vector.load %arg0[%c0_1, %c0_2] : memref<16x16xf32, #tpu.memory_space<vmem>>, vector<16x16xf32>
    %c0_3 = arith.constant 0 : index
    %c0_4 = arith.constant 0 : index
    %c0_5 = arith.constant 0 : index
    %2 = vector.load %arg2[%c0_3, %c0_4, %c0_5] : memref<2x160x96xbf16, #tpu.memory_space<vmem>>, vector<1x32x96xbf16>
    %3 = vector.shape_cast %2 : vector<1x32x96xbf16> to vector<32x96xbf16>
    %c0_6 = arith.constant 0 : index
    %c32 = arith.constant 32 : index
    %c0_7 = arith.constant 0 : index
    %4 = vector.load %arg2[%c0_6, %c32, %c0_7] : memref<2x160x96xbf16, #tpu.memory_space<vmem>>, vector<1x32x32xbf16>
    %5 = vector.shape_cast %4 : vector<1x32x32xbf16> to vector<32x32xbf16>
    %c0_8 = arith.constant 0 : index
    %c64 = arith.constant 64 : index
    %c0_9 = arith.constant 0 : index
    %6 = vector.load %arg2[%c0_8, %c64, %c0_9] : memref<2x160x96xbf16, #tpu.memory_space<vmem>>, vector<1x32x64xbf16>
    %7 = vector.shape_cast %6 : vector<1x32x64xbf16> to vector<32x64xbf16>
    %c0_10 = arith.constant 0 : index
    %c96 = arith.constant 96 : index
    %c0_11 = arith.constant 0 : index
    %8 = vector.load %arg2[%c0_10, %c96, %c0_11] : memref<2x160x96xbf16, #tpu.memory_space<vmem>>, vector<1x64x32xbf16>
    %9 = vector.shape_cast %8 : vector<1x64x32xbf16> to vector<64x32xbf16>
    %c0_12 = arith.constant 0 : index
    %c0_13 = arith.constant 0 : index
    %c0_14 = arith.constant 0 : index
    %10 = vector.load %arg3[%c0_12, %c0_13, %c0_14] : memref<2x8x96xf32, #tpu.memory_space<vmem>>, vector<1x1x96xf32>
    %11 = vector.shape_cast %10 : vector<1x1x96xf32> to vector<1x96xf32>
    %c0_15 = arith.constant 0 : index
    %c1 = arith.constant 1 : index
    %c0_16 = arith.constant 0 : index
    %12 = vector.load %arg3[%c0_15, %c1, %c0_16] : memref<2x8x96xf32, #tpu.memory_space<vmem>>, vector<1x1x32xf32>
    %13 = vector.shape_cast %12 : vector<1x1x32xf32> to vector<1x32xf32>
    %c0_17 = arith.constant 0 : index
    %c2 = arith.constant 2 : index
    %c0_18 = arith.constant 0 : index
    %14 = vector.load %arg3[%c0_17, %c2, %c0_18] : memref<2x8x96xf32, #tpu.memory_space<vmem>>, vector<1x1x32xf32>
    %15 = vector.shape_cast %14 : vector<1x1x32xf32> to vector<1x32xf32>
    %c0_19 = arith.constant 0 : index
    %c3 = arith.constant 3 : index
    %c0_20 = arith.constant 0 : index
    %16 = vector.load %arg3[%c0_19, %c3, %c0_20] : memref<2x8x96xf32, #tpu.memory_space<vmem>>, vector<1x1x32xf32>
    %17 = vector.shape_cast %16 : vector<1x1x32xf32> to vector<1x32xf32>
    %c0_21 = arith.constant 0 : index
    %c4 = arith.constant 4 : index
    %c0_22 = arith.constant 0 : index
    %18 = vector.load %arg3[%c0_21, %c4, %c0_22] : memref<2x8x96xf32, #tpu.memory_space<vmem>>, vector<1x1x64xf32>
    %19 = vector.shape_cast %18 : vector<1x1x64xf32> to vector<1x64xf32>
    %c0_23 = arith.constant 0 : index
    %c5 = arith.constant 5 : index
    %c0_24 = arith.constant 0 : index
    %20 = vector.load %arg3[%c0_23, %c5, %c0_24] : memref<2x8x96xf32, #tpu.memory_space<vmem>>, vector<1x1x32xf32>
    %21 = vector.shape_cast %20 : vector<1x1x32xf32> to vector<1x32xf32>
    %c0_25 = arith.constant 0 : index
    %c6 = arith.constant 6 : index
    %c0_26 = arith.constant 0 : index
    %22 = vector.load %arg3[%c0_25, %c6, %c0_26] : memref<2x8x96xf32, #tpu.memory_space<vmem>>, vector<1x1x32xf32>
    %23 = vector.shape_cast %22 : vector<1x1x32xf32> to vector<1x32xf32>
    %c0_27 = arith.constant 0 : index
    %c7 = arith.constant 7 : index
    %c0_28 = arith.constant 0 : index
    %24 = vector.load %arg3[%c0_27, %c7, %c0_28] : memref<2x8x96xf32, #tpu.memory_space<vmem>>, vector<1x1x32xf32>
    %25 = vector.shape_cast %24 : vector<1x1x32xf32> to vector<1x32xf32>
    %26 = arith.truncf %0 : vector<16x32xf32> to vector<16x32xbf16>
    %cst = arith.constant dense<0.000000e+00> : vector<16x96xf32>
    %27 = tpu.matmul %26, %3, %cst {dimension_numbers = #tpu.dot_dimension_numbers<[1], [0], [0], [1], [0, 0, 1, 1], [], []>} : vector<16x32xbf16>, vector<32x96xbf16>, vector<16x96xf32> -> vector<16x96xf32>
    %28 = vector.broadcast %11 : vector<1x96xf32> to vector<16x96xf32>
    %29 = arith.addf %27, %28 : vector<16x96xf32>
    %30 = vector.extract_strided_slice %29 {offsets = [0, 0], sizes = [16, 8], strides = [1, 1]} : vector<16x96xf32> to vector<16x8xf32>
    %31 = arith.truncf %30 : vector<16x8xf32> to vector<16x8xbf16>
    %32 = vector.extract_strided_slice %29 {offsets = [0, 32], sizes = [16, 8], strides = [1, 1]} : vector<16x96xf32> to vector<16x8xf32>
    %33 = arith.truncf %32 : vector<16x8xf32> to vector<16x8xbf16>
    %34 = vector.extract_strided_slice %29 {offsets = [0, 64], sizes = [16, 8], strides = [1, 1]} : vector<16x96xf32> to vector<16x8xf32>
    %35 = arith.truncf %34 : vector<16x8xf32> to vector<16x8xbf16>
    %cst_29 = arith.constant dense<0.000000e+00> : vector<16x16xf32>
    %36 = tpu.matmul %31, %33, %cst_29 {dimension_numbers = #tpu.dot_dimension_numbers<[1], [1], [0], [0], [0, 0, 1, 0], [], []>} : vector<16x8xbf16>, vector<16x8xbf16>, vector<16x16xf32> -> vector<16x16xf32>
    %37 = arith.addf %36, %1 : vector<16x16xf32>
    %cst_30 = arith.constant dense<0xFF800000> : vector<16xf32>
    %38 = vector.multi_reduction <maximumf>, %37, %cst_30 [1] : vector<16x16xf32> to vector<16xf32>
    %39 = vector.shape_cast %38 : vector<16xf32> to vector<16x1xf32>
    %40 = vector.broadcast %39 : vector<16x1xf32> to vector<16x16xf32>
    %41 = arith.subf %37, %40 : vector<16x16xf32>
    %42 = math.exp %41 : vector<16x16xf32>
    %cst_31 = arith.constant dense<0.000000e+00> : vector<16xf32>
    %43 = vector.multi_reduction <add>, %42, %cst_31 [1] : vector<16x16xf32> to vector<16xf32>
    %44 = vector.shape_cast %43 : vector<16xf32> to vector<16x1xf32>
    %45 = tpu.reciprocal %44 {approx = true} : vector<16x1xf32> -> vector<16x1xf32>
    %46 = vector.broadcast %45 : vector<16x1xf32> to vector<16x16xf32>
    %47 = arith.mulf %42, %46 : vector<16x16xf32>
    %48 = arith.truncf %47 : vector<16x16xf32> to vector<16x16xbf16>
    %cst_32 = arith.constant dense<0.000000e+00> : vector<16x8xf32>
    %49 = tpu.matmul %48, %35, %cst_32 {dimension_numbers = #tpu.dot_dimension_numbers<[1], [0], [0], [1], [0, 0, 1, 1], [], []>} : vector<16x16xbf16>, vector<16x8xbf16>, vector<16x8xf32> -> vector<16x8xf32>
    %50 = vector.extract_strided_slice %29 {offsets = [0, 8], sizes = [16, 8], strides = [1, 1]} : vector<16x96xf32> to vector<16x8xf32>
    %51 = arith.truncf %50 : vector<16x8xf32> to vector<16x8xbf16>
    %52 = vector.extract_strided_slice %29 {offsets = [0, 40], sizes = [16, 8], strides = [1, 1]} : vector<16x96xf32> to vector<16x8xf32>
    %53 = arith.truncf %52 : vector<16x8xf32> to vector<16x8xbf16>
    %54 = vector.extract_strided_slice %29 {offsets = [0, 72], sizes = [16, 8], strides = [1, 1]} : vector<16x96xf32> to vector<16x8xf32>
    %55 = arith.truncf %54 : vector<16x8xf32> to vector<16x8xbf16>
    %cst_33 = arith.constant dense<0.000000e+00> : vector<16x16xf32>
    %56 = tpu.matmul %51, %53, %cst_33 {dimension_numbers = #tpu.dot_dimension_numbers<[1], [1], [0], [0], [0, 0, 1, 0], [], []>} : vector<16x8xbf16>, vector<16x8xbf16>, vector<16x16xf32> -> vector<16x16xf32>
    %57 = arith.addf %56, %1 : vector<16x16xf32>
    %cst_34 = arith.constant dense<0xFF800000> : vector<16xf32>
    %58 = vector.multi_reduction <maximumf>, %57, %cst_34 [1] : vector<16x16xf32> to vector<16xf32>
    %59 = vector.shape_cast %58 : vector<16xf32> to vector<16x1xf32>
    %60 = vector.broadcast %59 : vector<16x1xf32> to vector<16x16xf32>
    %61 = arith.subf %57, %60 : vector<16x16xf32>
    %62 = math.exp %61 : vector<16x16xf32>
    %cst_35 = arith.constant dense<0.000000e+00> : vector<16xf32>
    %63 = vector.multi_reduction <add>, %62, %cst_35 [1] : vector<16x16xf32> to vector<16xf32>
    %64 = vector.shape_cast %63 : vector<16xf32> to vector<16x1xf32>
    %65 = tpu.reciprocal %64 {approx = true} : vector<16x1xf32> -> vector<16x1xf32>
    %66 = vector.broadcast %65 : vector<16x1xf32> to vector<16x16xf32>
    %67 = arith.mulf %62, %66 : vector<16x16xf32>
    %68 = arith.truncf %67 : vector<16x16xf32> to vector<16x16xbf16>
    %cst_36 = arith.constant dense<0.000000e+00> : vector<16x8xf32>
    %69 = tpu.matmul %68, %55, %cst_36 {dimension_numbers = #tpu.dot_dimension_numbers<[1], [0], [0], [1], [0, 0, 1, 1], [], []>} : vector<16x16xbf16>, vector<16x8xbf16>, vector<16x8xf32> -> vector<16x8xf32>
    %70 = vector.extract_strided_slice %29 {offsets = [0, 16], sizes = [16, 8], strides = [1, 1]} : vector<16x96xf32> to vector<16x8xf32>
    %71 = arith.truncf %70 : vector<16x8xf32> to vector<16x8xbf16>
    %72 = vector.extract_strided_slice %29 {offsets = [0, 48], sizes = [16, 8], strides = [1, 1]} : vector<16x96xf32> to vector<16x8xf32>
    %73 = arith.truncf %72 : vector<16x8xf32> to vector<16x8xbf16>
    %74 = vector.extract_strided_slice %29 {offsets = [0, 80], sizes = [16, 8], strides = [1, 1]} : vector<16x96xf32> to vector<16x8xf32>
    %75 = arith.truncf %74 : vector<16x8xf32> to vector<16x8xbf16>
    %cst_37 = arith.constant dense<0.000000e+00> : vector<16x16xf32>
    %76 = tpu.matmul %71, %73, %cst_37 {dimension_numbers = #tpu.dot_dimension_numbers<[1], [1], [0], [0], [0, 0, 1, 0], [], []>} : vector<16x8xbf16>, vector<16x8xbf16>, vector<16x16xf32> -> vector<16x16xf32>
    %77 = arith.addf %76, %1 : vector<16x16xf32>
    %cst_38 = arith.constant dense<0xFF800000> : vector<16xf32>
    %78 = vector.multi_reduction <maximumf>, %77, %cst_38 [1] : vector<16x16xf32> to vector<16xf32>
    %79 = vector.shape_cast %78 : vector<16xf32> to vector<16x1xf32>
    %80 = vector.broadcast %79 : vector<16x1xf32> to vector<16x16xf32>
    %81 = arith.subf %77, %80 : vector<16x16xf32>
    %82 = math.exp %81 : vector<16x16xf32>
    %cst_39 = arith.constant dense<0.000000e+00> : vector<16xf32>
    %83 = vector.multi_reduction <add>, %82, %cst_39 [1] : vector<16x16xf32> to vector<16xf32>
    %84 = vector.shape_cast %83 : vector<16xf32> to vector<16x1xf32>
    %85 = tpu.reciprocal %84 {approx = true} : vector<16x1xf32> -> vector<16x1xf32>
    %86 = vector.broadcast %85 : vector<16x1xf32> to vector<16x16xf32>
    %87 = arith.mulf %82, %86 : vector<16x16xf32>
    %88 = arith.truncf %87 : vector<16x16xf32> to vector<16x16xbf16>
    %cst_40 = arith.constant dense<0.000000e+00> : vector<16x8xf32>
    %89 = tpu.matmul %88, %75, %cst_40 {dimension_numbers = #tpu.dot_dimension_numbers<[1], [0], [0], [1], [0, 0, 1, 1], [], []>} : vector<16x16xbf16>, vector<16x8xbf16>, vector<16x8xf32> -> vector<16x8xf32>
    %90 = vector.extract_strided_slice %29 {offsets = [0, 24], sizes = [16, 8], strides = [1, 1]} : vector<16x96xf32> to vector<16x8xf32>
    %91 = arith.truncf %90 : vector<16x8xf32> to vector<16x8xbf16>
    %92 = vector.extract_strided_slice %29 {offsets = [0, 56], sizes = [16, 8], strides = [1, 1]} : vector<16x96xf32> to vector<16x8xf32>
    %93 = arith.truncf %92 : vector<16x8xf32> to vector<16x8xbf16>
    %94 = vector.extract_strided_slice %29 {offsets = [0, 88], sizes = [16, 8], strides = [1, 1]} : vector<16x96xf32> to vector<16x8xf32>
    %95 = arith.truncf %94 : vector<16x8xf32> to vector<16x8xbf16>
    %cst_41 = arith.constant dense<0.000000e+00> : vector<16x16xf32>
    %96 = tpu.matmul %91, %93, %cst_41 {dimension_numbers = #tpu.dot_dimension_numbers<[1], [1], [0], [0], [0, 0, 1, 0], [], []>} : vector<16x8xbf16>, vector<16x8xbf16>, vector<16x16xf32> -> vector<16x16xf32>
    %97 = arith.addf %96, %1 : vector<16x16xf32>
    %cst_42 = arith.constant dense<0xFF800000> : vector<16xf32>
    %98 = vector.multi_reduction <maximumf>, %97, %cst_42 [1] : vector<16x16xf32> to vector<16xf32>
    %99 = vector.shape_cast %98 : vector<16xf32> to vector<16x1xf32>
    %100 = vector.broadcast %99 : vector<16x1xf32> to vector<16x16xf32>
    %101 = arith.subf %97, %100 : vector<16x16xf32>
    %102 = math.exp %101 : vector<16x16xf32>
    %cst_43 = arith.constant dense<0.000000e+00> : vector<16xf32>
    %103 = vector.multi_reduction <add>, %102, %cst_43 [1] : vector<16x16xf32> to vector<16xf32>
    %104 = vector.shape_cast %103 : vector<16xf32> to vector<16x1xf32>
    %105 = tpu.reciprocal %104 {approx = true} : vector<16x1xf32> -> vector<16x1xf32>
    %106 = vector.broadcast %105 : vector<16x1xf32> to vector<16x16xf32>
    %107 = arith.mulf %102, %106 : vector<16x16xf32>
    %108 = arith.truncf %107 : vector<16x16xf32> to vector<16x16xbf16>
    %cst_44 = arith.constant dense<0.000000e+00> : vector<16x8xf32>
    %109 = tpu.matmul %108, %95, %cst_44 {dimension_numbers = #tpu.dot_dimension_numbers<[1], [0], [0], [1], [0, 0, 1, 1], [], []>} : vector<16x16xbf16>, vector<16x8xbf16>, vector<16x8xf32> -> vector<16x8xf32>
    %110 = tpu.concatenate %49, %69, %89, %109 in 1 : vector<16x8xf32>, vector<16x8xf32>, vector<16x8xf32>, vector<16x8xf32> -> vector<16x32xf32>
    %111 = arith.truncf %110 : vector<16x32xf32> to vector<16x32xbf16>
    %cst_45 = arith.constant dense<0.000000e+00> : vector<16x32xf32>
    %112 = tpu.matmul %111, %5, %cst_45 {dimension_numbers = #tpu.dot_dimension_numbers<[1], [0], [0], [1], [0, 0, 1, 1], [], []>} : vector<16x32xbf16>, vector<32x32xbf16>, vector<16x32xf32> -> vector<16x32xf32>
    %113 = vector.broadcast %13 : vector<1x32xf32> to vector<16x32xf32>
    %114 = arith.addf %112, %113 : vector<16x32xf32>
    %115 = arith.addf %0, %114 : vector<16x32xf32>
    %cst_46 = arith.constant dense<0.000000e+00> : vector<16xf32>
    %116 = vector.multi_reduction <add>, %115, %cst_46 [1] : vector<16x32xf32> to vector<16xf32>
    %117 = vector.shape_cast %116 : vector<16xf32> to vector<16x1xf32>
    %cst_47 = arith.constant 3.200000e+01 : f32
    %118 = vector.broadcast %cst_47 : f32 to vector<16x1xf32>
    %119 = arith.divf %117, %118 : vector<16x1xf32>
    %120 = vector.broadcast %119 : vector<16x1xf32> to vector<16x32xf32>
    %121 = arith.subf %115, %120 : vector<16x32xf32>
    %122 = arith.mulf %121, %121 : vector<16x32xf32>
    %cst_48 = arith.constant dense<0.000000e+00> : vector<16xf32>
    %123 = vector.multi_reduction <add>, %122, %cst_48 [1] : vector<16x32xf32> to vector<16xf32>
    %124 = vector.shape_cast %123 : vector<16xf32> to vector<16x1xf32>
    %cst_49 = arith.constant 3.200000e+01 : f32
    %125 = vector.broadcast %cst_49 : f32 to vector<16x1xf32>
    %126 = arith.divf %124, %125 : vector<16x1xf32>
    %cst_50 = arith.constant 9.99999974E-6 : f32
    %127 = vector.broadcast %cst_50 : f32 to vector<16x1xf32>
    %128 = arith.addf %126, %127 : vector<16x1xf32>
    %129 = math.rsqrt %128 : vector<16x1xf32>
    %130 = vector.broadcast %129 : vector<16x1xf32> to vector<16x32xf32>
    %131 = arith.mulf %121, %130 : vector<16x32xf32>
    %132 = vector.broadcast %15 : vector<1x32xf32> to vector<16x32xf32>
    %133 = arith.mulf %131, %132 : vector<16x32xf32>
    %134 = vector.broadcast %17 : vector<1x32xf32> to vector<16x32xf32>
    %135 = arith.addf %133, %134 : vector<16x32xf32>
    %136 = arith.truncf %135 : vector<16x32xf32> to vector<16x32xbf16>
    %cst_51 = arith.constant dense<0.000000e+00> : vector<16x64xf32>
    %137 = tpu.matmul %136, %7, %cst_51 {dimension_numbers = #tpu.dot_dimension_numbers<[1], [0], [0], [1], [0, 0, 1, 1], [], []>} : vector<16x32xbf16>, vector<32x64xbf16>, vector<16x64xf32> -> vector<16x64xf32>
    %138 = vector.broadcast %19 : vector<1x64xf32> to vector<16x64xf32>
    %139 = arith.addf %137, %138 : vector<16x64xf32>
    %cst_52 = arith.constant 0.000000e+00 : f32
    %140 = vector.broadcast %cst_52 : f32 to vector<16x64xf32>
    %141 = arith.maximumf %139, %140 : vector<16x64xf32>
    %142 = arith.truncf %141 : vector<16x64xf32> to vector<16x64xbf16>
    %cst_53 = arith.constant dense<0.000000e+00> : vector<16x32xf32>
    %143 = tpu.matmul %142, %9, %cst_53 {dimension_numbers = #tpu.dot_dimension_numbers<[1], [0], [0], [1], [0, 0, 1, 1], [], []>} : vector<16x64xbf16>, vector<64x32xbf16>, vector<16x32xf32> -> vector<16x32xf32>
    %144 = vector.broadcast %21 : vector<1x32xf32> to vector<16x32xf32>
    %145 = arith.addf %143, %144 : vector<16x32xf32>
    %146 = arith.addf %135, %145 : vector<16x32xf32>
    %cst_54 = arith.constant dense<0.000000e+00> : vector<16xf32>
    %147 = vector.multi_reduction <add>, %146, %cst_54 [1] : vector<16x32xf32> to vector<16xf32>
    %148 = vector.shape_cast %147 : vector<16xf32> to vector<16x1xf32>
    %cst_55 = arith.constant 3.200000e+01 : f32
    %149 = vector.broadcast %cst_55 : f32 to vector<16x1xf32>
    %150 = arith.divf %148, %149 : vector<16x1xf32>
    %151 = vector.broadcast %150 : vector<16x1xf32> to vector<16x32xf32>
    %152 = arith.subf %146, %151 : vector<16x32xf32>
    %153 = arith.mulf %152, %152 : vector<16x32xf32>
    %cst_56 = arith.constant dense<0.000000e+00> : vector<16xf32>
    %154 = vector.multi_reduction <add>, %153, %cst_56 [1] : vector<16x32xf32> to vector<16xf32>
    %155 = vector.shape_cast %154 : vector<16xf32> to vector<16x1xf32>
    %cst_57 = arith.constant 3.200000e+01 : f32
    %156 = vector.broadcast %cst_57 : f32 to vector<16x1xf32>
    %157 = arith.divf %155, %156 : vector<16x1xf32>
    %cst_58 = arith.constant 9.99999974E-6 : f32
    %158 = vector.broadcast %cst_58 : f32 to vector<16x1xf32>
    %159 = arith.addf %157, %158 : vector<16x1xf32>
    %160 = math.rsqrt %159 : vector<16x1xf32>
    %161 = vector.broadcast %160 : vector<16x1xf32> to vector<16x32xf32>
    %162 = arith.mulf %152, %161 : vector<16x32xf32>
    %163 = vector.broadcast %23 : vector<1x32xf32> to vector<16x32xf32>
    %164 = arith.mulf %162, %163 : vector<16x32xf32>
    %165 = vector.broadcast %25 : vector<1x32xf32> to vector<16x32xf32>
    %166 = arith.addf %164, %165 : vector<16x32xf32>
    %c1_59 = arith.constant 1 : index
    %c0_60 = arith.constant 0 : index
    %c0_61 = arith.constant 0 : index
    %167 = vector.load %arg2[%c1_59, %c0_60, %c0_61] : memref<2x160x96xbf16, #tpu.memory_space<vmem>>, vector<1x32x96xbf16>
    %168 = vector.shape_cast %167 : vector<1x32x96xbf16> to vector<32x96xbf16>
    %c1_62 = arith.constant 1 : index
    %c32_63 = arith.constant 32 : index
    %c0_64 = arith.constant 0 : index
    %169 = vector.load %arg2[%c1_62, %c32_63, %c0_64] : memref<2x160x96xbf16, #tpu.memory_space<vmem>>, vector<1x32x32xbf16>
    %170 = vector.shape_cast %169 : vector<1x32x32xbf16> to vector<32x32xbf16>
    %c1_65 = arith.constant 1 : index
    %c64_66 = arith.constant 64 : index
    %c0_67 = arith.constant 0 : index
    %171 = vector.load %arg2[%c1_65, %c64_66, %c0_67] : memref<2x160x96xbf16, #tpu.memory_space<vmem>>, vector<1x32x64xbf16>
    %172 = vector.shape_cast %171 : vector<1x32x64xbf16> to vector<32x64xbf16>
    %c1_68 = arith.constant 1 : index
    %c96_69 = arith.constant 96 : index
    %c0_70 = arith.constant 0 : index
    %173 = vector.load %arg2[%c1_68, %c96_69, %c0_70] : memref<2x160x96xbf16, #tpu.memory_space<vmem>>, vector<1x64x32xbf16>
    %174 = vector.shape_cast %173 : vector<1x64x32xbf16> to vector<64x32xbf16>
    %c1_71 = arith.constant 1 : index
    %c0_72 = arith.constant 0 : index
    %c0_73 = arith.constant 0 : index
    %175 = vector.load %arg3[%c1_71, %c0_72, %c0_73] : memref<2x8x96xf32, #tpu.memory_space<vmem>>, vector<1x1x96xf32>
    %176 = vector.shape_cast %175 : vector<1x1x96xf32> to vector<1x96xf32>
    %c1_74 = arith.constant 1 : index
    %c1_75 = arith.constant 1 : index
    %c0_76 = arith.constant 0 : index
    %177 = vector.load %arg3[%c1_74, %c1_75, %c0_76] : memref<2x8x96xf32, #tpu.memory_space<vmem>>, vector<1x1x32xf32>
    %178 = vector.shape_cast %177 : vector<1x1x32xf32> to vector<1x32xf32>
    %c1_77 = arith.constant 1 : index
    %c2_78 = arith.constant 2 : index
    %c0_79 = arith.constant 0 : index
    %179 = vector.load %arg3[%c1_77, %c2_78, %c0_79] : memref<2x8x96xf32, #tpu.memory_space<vmem>>, vector<1x1x32xf32>
    %180 = vector.shape_cast %179 : vector<1x1x32xf32> to vector<1x32xf32>
    %c1_80 = arith.constant 1 : index
    %c3_81 = arith.constant 3 : index
    %c0_82 = arith.constant 0 : index
    %181 = vector.load %arg3[%c1_80, %c3_81, %c0_82] : memref<2x8x96xf32, #tpu.memory_space<vmem>>, vector<1x1x32xf32>
    %182 = vector.shape_cast %181 : vector<1x1x32xf32> to vector<1x32xf32>
    %c1_83 = arith.constant 1 : index
    %c4_84 = arith.constant 4 : index
    %c0_85 = arith.constant 0 : index
    %183 = vector.load %arg3[%c1_83, %c4_84, %c0_85] : memref<2x8x96xf32, #tpu.memory_space<vmem>>, vector<1x1x64xf32>
    %184 = vector.shape_cast %183 : vector<1x1x64xf32> to vector<1x64xf32>
    %c1_86 = arith.constant 1 : index
    %c5_87 = arith.constant 5 : index
    %c0_88 = arith.constant 0 : index
    %185 = vector.load %arg3[%c1_86, %c5_87, %c0_88] : memref<2x8x96xf32, #tpu.memory_space<vmem>>, vector<1x1x32xf32>
    %186 = vector.shape_cast %185 : vector<1x1x32xf32> to vector<1x32xf32>
    %c1_89 = arith.constant 1 : index
    %c6_90 = arith.constant 6 : index
    %c0_91 = arith.constant 0 : index
    %187 = vector.load %arg3[%c1_89, %c6_90, %c0_91] : memref<2x8x96xf32, #tpu.memory_space<vmem>>, vector<1x1x32xf32>
    %188 = vector.shape_cast %187 : vector<1x1x32xf32> to vector<1x32xf32>
    %c1_92 = arith.constant 1 : index
    %c7_93 = arith.constant 7 : index
    %c0_94 = arith.constant 0 : index
    %189 = vector.load %arg3[%c1_92, %c7_93, %c0_94] : memref<2x8x96xf32, #tpu.memory_space<vmem>>, vector<1x1x32xf32>
    %190 = vector.shape_cast %189 : vector<1x1x32xf32> to vector<1x32xf32>
    %191 = arith.truncf %166 : vector<16x32xf32> to vector<16x32xbf16>
    %cst_95 = arith.constant dense<0.000000e+00> : vector<16x96xf32>
    %192 = tpu.matmul %191, %168, %cst_95 {dimension_numbers = #tpu.dot_dimension_numbers<[1], [0], [0], [1], [0, 0, 1, 1], [], []>} : vector<16x32xbf16>, vector<32x96xbf16>, vector<16x96xf32> -> vector<16x96xf32>
    %193 = vector.broadcast %176 : vector<1x96xf32> to vector<16x96xf32>
    %194 = arith.addf %192, %193 : vector<16x96xf32>
    %195 = vector.extract_strided_slice %194 {offsets = [0, 0], sizes = [16, 8], strides = [1, 1]} : vector<16x96xf32> to vector<16x8xf32>
    %196 = arith.truncf %195 : vector<16x8xf32> to vector<16x8xbf16>
    %197 = vector.extract_strided_slice %194 {offsets = [0, 32], sizes = [16, 8], strides = [1, 1]} : vector<16x96xf32> to vector<16x8xf32>
    %198 = arith.truncf %197 : vector<16x8xf32> to vector<16x8xbf16>
    %199 = vector.extract_strided_slice %194 {offsets = [0, 64], sizes = [16, 8], strides = [1, 1]} : vector<16x96xf32> to vector<16x8xf32>
    %200 = arith.truncf %199 : vector<16x8xf32> to vector<16x8xbf16>
    %cst_96 = arith.constant dense<0.000000e+00> : vector<16x16xf32>
    %201 = tpu.matmul %196, %198, %cst_96 {dimension_numbers = #tpu.dot_dimension_numbers<[1], [1], [0], [0], [0, 0, 1, 0], [], []>} : vector<16x8xbf16>, vector<16x8xbf16>, vector<16x16xf32> -> vector<16x16xf32>
    %202 = arith.addf %201, %1 : vector<16x16xf32>
    %cst_97 = arith.constant dense<0xFF800000> : vector<16xf32>
    %203 = vector.multi_reduction <maximumf>, %202, %cst_97 [1] : vector<16x16xf32> to vector<16xf32>
    %204 = vector.shape_cast %203 : vector<16xf32> to vector<16x1xf32>
    %205 = vector.broadcast %204 : vector<16x1xf32> to vector<16x16xf32>
    %206 = arith.subf %202, %205 : vector<16x16xf32>
    %207 = math.exp %206 : vector<16x16xf32>
    %cst_98 = arith.constant dense<0.000000e+00> : vector<16xf32>
    %208 = vector.multi_reduction <add>, %207, %cst_98 [1] : vector<16x16xf32> to vector<16xf32>
    %209 = vector.shape_cast %208 : vector<16xf32> to vector<16x1xf32>
    %210 = tpu.reciprocal %209 {approx = true} : vector<16x1xf32> -> vector<16x1xf32>
    %211 = vector.broadcast %210 : vector<16x1xf32> to vector<16x16xf32>
    %212 = arith.mulf %207, %211 : vector<16x16xf32>
    %213 = arith.truncf %212 : vector<16x16xf32> to vector<16x16xbf16>
    %cst_99 = arith.constant dense<0.000000e+00> : vector<16x8xf32>
    %214 = tpu.matmul %213, %200, %cst_99 {dimension_numbers = #tpu.dot_dimension_numbers<[1], [0], [0], [1], [0, 0, 1, 1], [], []>} : vector<16x16xbf16>, vector<16x8xbf16>, vector<16x8xf32> -> vector<16x8xf32>
    %215 = vector.extract_strided_slice %194 {offsets = [0, 8], sizes = [16, 8], strides = [1, 1]} : vector<16x96xf32> to vector<16x8xf32>
    %216 = arith.truncf %215 : vector<16x8xf32> to vector<16x8xbf16>
    %217 = vector.extract_strided_slice %194 {offsets = [0, 40], sizes = [16, 8], strides = [1, 1]} : vector<16x96xf32> to vector<16x8xf32>
    %218 = arith.truncf %217 : vector<16x8xf32> to vector<16x8xbf16>
    %219 = vector.extract_strided_slice %194 {offsets = [0, 72], sizes = [16, 8], strides = [1, 1]} : vector<16x96xf32> to vector<16x8xf32>
    %220 = arith.truncf %219 : vector<16x8xf32> to vector<16x8xbf16>
    %cst_100 = arith.constant dense<0.000000e+00> : vector<16x16xf32>
    %221 = tpu.matmul %216, %218, %cst_100 {dimension_numbers = #tpu.dot_dimension_numbers<[1], [1], [0], [0], [0, 0, 1, 0], [], []>} : vector<16x8xbf16>, vector<16x8xbf16>, vector<16x16xf32> -> vector<16x16xf32>
    %222 = arith.addf %221, %1 : vector<16x16xf32>
    %cst_101 = arith.constant dense<0xFF800000> : vector<16xf32>
    %223 = vector.multi_reduction <maximumf>, %222, %cst_101 [1] : vector<16x16xf32> to vector<16xf32>
    %224 = vector.shape_cast %223 : vector<16xf32> to vector<16x1xf32>
    %225 = vector.broadcast %224 : vector<16x1xf32> to vector<16x16xf32>
    %226 = arith.subf %222, %225 : vector<16x16xf32>
    %227 = math.exp %226 : vector<16x16xf32>
    %cst_102 = arith.constant dense<0.000000e+00> : vector<16xf32>
    %228 = vector.multi_reduction <add>, %227, %cst_102 [1] : vector<16x16xf32> to vector<16xf32>
    %229 = vector.shape_cast %228 : vector<16xf32> to vector<16x1xf32>
    %230 = tpu.reciprocal %229 {approx = true} : vector<16x1xf32> -> vector<16x1xf32>
    %231 = vector.broadcast %230 : vector<16x1xf32> to vector<16x16xf32>
    %232 = arith.mulf %227, %231 : vector<16x16xf32>
    %233 = arith.truncf %232 : vector<16x16xf32> to vector<16x16xbf16>
    %cst_103 = arith.constant dense<0.000000e+00> : vector<16x8xf32>
    %234 = tpu.matmul %233, %220, %cst_103 {dimension_numbers = #tpu.dot_dimension_numbers<[1], [0], [0], [1], [0, 0, 1, 1], [], []>} : vector<16x16xbf16>, vector<16x8xbf16>, vector<16x8xf32> -> vector<16x8xf32>
    %235 = vector.extract_strided_slice %194 {offsets = [0, 16], sizes = [16, 8], strides = [1, 1]} : vector<16x96xf32> to vector<16x8xf32>
    %236 = arith.truncf %235 : vector<16x8xf32> to vector<16x8xbf16>
    %237 = vector.extract_strided_slice %194 {offsets = [0, 48], sizes = [16, 8], strides = [1, 1]} : vector<16x96xf32> to vector<16x8xf32>
    %238 = arith.truncf %237 : vector<16x8xf32> to vector<16x8xbf16>
    %239 = vector.extract_strided_slice %194 {offsets = [0, 80], sizes = [16, 8], strides = [1, 1]} : vector<16x96xf32> to vector<16x8xf32>
    %240 = arith.truncf %239 : vector<16x8xf32> to vector<16x8xbf16>
    %cst_104 = arith.constant dense<0.000000e+00> : vector<16x16xf32>
    %241 = tpu.matmul %236, %238, %cst_104 {dimension_numbers = #tpu.dot_dimension_numbers<[1], [1], [0], [0], [0, 0, 1, 0], [], []>} : vector<16x8xbf16>, vector<16x8xbf16>, vector<16x16xf32> -> vector<16x16xf32>
    %242 = arith.addf %241, %1 : vector<16x16xf32>
    %cst_105 = arith.constant dense<0xFF800000> : vector<16xf32>
    %243 = vector.multi_reduction <maximumf>, %242, %cst_105 [1] : vector<16x16xf32> to vector<16xf32>
    %244 = vector.shape_cast %243 : vector<16xf32> to vector<16x1xf32>
    %245 = vector.broadcast %244 : vector<16x1xf32> to vector<16x16xf32>
    %246 = arith.subf %242, %245 : vector<16x16xf32>
    %247 = math.exp %246 : vector<16x16xf32>
    %cst_106 = arith.constant dense<0.000000e+00> : vector<16xf32>
    %248 = vector.multi_reduction <add>, %247, %cst_106 [1] : vector<16x16xf32> to vector<16xf32>
    %249 = vector.shape_cast %248 : vector<16xf32> to vector<16x1xf32>
    %250 = tpu.reciprocal %249 {approx = true} : vector<16x1xf32> -> vector<16x1xf32>
    %251 = vector.broadcast %250 : vector<16x1xf32> to vector<16x16xf32>
    %252 = arith.mulf %247, %251 : vector<16x16xf32>
    %253 = arith.truncf %252 : vector<16x16xf32> to vector<16x16xbf16>
    %cst_107 = arith.constant dense<0.000000e+00> : vector<16x8xf32>
    %254 = tpu.matmul %253, %240, %cst_107 {dimension_numbers = #tpu.dot_dimension_numbers<[1], [0], [0], [1], [0, 0, 1, 1], [], []>} : vector<16x16xbf16>, vector<16x8xbf16>, vector<16x8xf32> -> vector<16x8xf32>
    %255 = vector.extract_strided_slice %194 {offsets = [0, 24], sizes = [16, 8], strides = [1, 1]} : vector<16x96xf32> to vector<16x8xf32>
    %256 = arith.truncf %255 : vector<16x8xf32> to vector<16x8xbf16>
    %257 = vector.extract_strided_slice %194 {offsets = [0, 56], sizes = [16, 8], strides = [1, 1]} : vector<16x96xf32> to vector<16x8xf32>
    %258 = arith.truncf %257 : vector<16x8xf32> to vector<16x8xbf16>
    %259 = vector.extract_strided_slice %194 {offsets = [0, 88], sizes = [16, 8], strides = [1, 1]} : vector<16x96xf32> to vector<16x8xf32>
    %260 = arith.truncf %259 : vector<16x8xf32> to vector<16x8xbf16>
    %cst_108 = arith.constant dense<0.000000e+00> : vector<16x16xf32>
    %261 = tpu.matmul %256, %258, %cst_108 {dimension_numbers = #tpu.dot_dimension_numbers<[1], [1], [0], [0], [0, 0, 1, 0], [], []>} : vector<16x8xbf16>, vector<16x8xbf16>, vector<16x16xf32> -> vector<16x16xf32>
    %262 = arith.addf %261, %1 : vector<16x16xf32>
    %cst_109 = arith.constant dense<0xFF800000> : vector<16xf32>
    %263 = vector.multi_reduction <maximumf>, %262, %cst_109 [1] : vector<16x16xf32> to vector<16xf32>
    %264 = vector.shape_cast %263 : vector<16xf32> to vector<16x1xf32>
    %265 = vector.broadcast %264 : vector<16x1xf32> to vector<16x16xf32>
    %266 = arith.subf %262, %265 : vector<16x16xf32>
    %267 = math.exp %266 : vector<16x16xf32>
    %cst_110 = arith.constant dense<0.000000e+00> : vector<16xf32>
    %268 = vector.multi_reduction <add>, %267, %cst_110 [1] : vector<16x16xf32> to vector<16xf32>
    %269 = vector.shape_cast %268 : vector<16xf32> to vector<16x1xf32>
    %270 = tpu.reciprocal %269 {approx = true} : vector<16x1xf32> -> vector<16x1xf32>
    %271 = vector.broadcast %270 : vector<16x1xf32> to vector<16x16xf32>
    %272 = arith.mulf %267, %271 : vector<16x16xf32>
    %273 = arith.truncf %272 : vector<16x16xf32> to vector<16x16xbf16>
    %cst_111 = arith.constant dense<0.000000e+00> : vector<16x8xf32>
    %274 = tpu.matmul %273, %260, %cst_111 {dimension_numbers = #tpu.dot_dimension_numbers<[1], [0], [0], [1], [0, 0, 1, 1], [], []>} : vector<16x16xbf16>, vector<16x8xbf16>, vector<16x8xf32> -> vector<16x8xf32>
    %275 = tpu.concatenate %214, %234, %254, %274 in 1 : vector<16x8xf32>, vector<16x8xf32>, vector<16x8xf32>, vector<16x8xf32> -> vector<16x32xf32>
    %276 = arith.truncf %275 : vector<16x32xf32> to vector<16x32xbf16>
    %cst_112 = arith.constant dense<0.000000e+00> : vector<16x32xf32>
    %277 = tpu.matmul %276, %170, %cst_112 {dimension_numbers = #tpu.dot_dimension_numbers<[1], [0], [0], [1], [0, 0, 1, 1], [], []>} : vector<16x32xbf16>, vector<32x32xbf16>, vector<16x32xf32> -> vector<16x32xf32>
    %278 = vector.broadcast %178 : vector<1x32xf32> to vector<16x32xf32>
    %279 = arith.addf %277, %278 : vector<16x32xf32>
    %280 = arith.addf %166, %279 : vector<16x32xf32>
    %cst_113 = arith.constant dense<0.000000e+00> : vector<16xf32>
    %281 = vector.multi_reduction <add>, %280, %cst_113 [1] : vector<16x32xf32> to vector<16xf32>
    %282 = vector.shape_cast %281 : vector<16xf32> to vector<16x1xf32>
    %cst_114 = arith.constant 3.200000e+01 : f32
    %283 = vector.broadcast %cst_114 : f32 to vector<16x1xf32>
    %284 = arith.divf %282, %283 : vector<16x1xf32>
    %285 = vector.broadcast %284 : vector<16x1xf32> to vector<16x32xf32>
    %286 = arith.subf %280, %285 : vector<16x32xf32>
    %287 = arith.mulf %286, %286 : vector<16x32xf32>
    %cst_115 = arith.constant dense<0.000000e+00> : vector<16xf32>
    %288 = vector.multi_reduction <add>, %287, %cst_115 [1] : vector<16x32xf32> to vector<16xf32>
    %289 = vector.shape_cast %288 : vector<16xf32> to vector<16x1xf32>
    %cst_116 = arith.constant 3.200000e+01 : f32
    %290 = vector.broadcast %cst_116 : f32 to vector<16x1xf32>
    %291 = arith.divf %289, %290 : vector<16x1xf32>
    %cst_117 = arith.constant 9.99999974E-6 : f32
    %292 = vector.broadcast %cst_117 : f32 to vector<16x1xf32>
    %293 = arith.addf %291, %292 : vector<16x1xf32>
    %294 = math.rsqrt %293 : vector<16x1xf32>
    %295 = vector.broadcast %294 : vector<16x1xf32> to vector<16x32xf32>
    %296 = arith.mulf %286, %295 : vector<16x32xf32>
    %297 = vector.broadcast %180 : vector<1x32xf32> to vector<16x32xf32>
    %298 = arith.mulf %296, %297 : vector<16x32xf32>
    %299 = vector.broadcast %182 : vector<1x32xf32> to vector<16x32xf32>
    %300 = arith.addf %298, %299 : vector<16x32xf32>
    %301 = arith.truncf %300 : vector<16x32xf32> to vector<16x32xbf16>
    %cst_118 = arith.constant dense<0.000000e+00> : vector<16x64xf32>
    %302 = tpu.matmul %301, %172, %cst_118 {dimension_numbers = #tpu.dot_dimension_numbers<[1], [0], [0], [1], [0, 0, 1, 1], [], []>} : vector<16x32xbf16>, vector<32x64xbf16>, vector<16x64xf32> -> vector<16x64xf32>
    %303 = vector.broadcast %184 : vector<1x64xf32> to vector<16x64xf32>
    %304 = arith.addf %302, %303 : vector<16x64xf32>
    %cst_119 = arith.constant 0.000000e+00 : f32
    %305 = vector.broadcast %cst_119 : f32 to vector<16x64xf32>
    %306 = arith.maximumf %304, %305 : vector<16x64xf32>
    %307 = arith.truncf %306 : vector<16x64xf32> to vector<16x64xbf16>
    %cst_120 = arith.constant dense<0.000000e+00> : vector<16x32xf32>
    %308 = tpu.matmul %307, %174, %cst_120 {dimension_numbers = #tpu.dot_dimension_numbers<[1], [0], [0], [1], [0, 0, 1, 1], [], []>} : vector<16x64xbf16>, vector<64x32xbf16>, vector<16x32xf32> -> vector<16x32xf32>
    %309 = vector.broadcast %186 : vector<1x32xf32> to vector<16x32xf32>
    %310 = arith.addf %308, %309 : vector<16x32xf32>
    %311 = arith.addf %300, %310 : vector<16x32xf32>
    %cst_121 = arith.constant dense<0.000000e+00> : vector<16xf32>
    %312 = vector.multi_reduction <add>, %311, %cst_121 [1] : vector<16x32xf32> to vector<16xf32>
    %313 = vector.shape_cast %312 : vector<16xf32> to vector<16x1xf32>
    %cst_122 = arith.constant 3.200000e+01 : f32
    %314 = vector.broadcast %cst_122 : f32 to vector<16x1xf32>
    %315 = arith.divf %313, %314 : vector<16x1xf32>
    %316 = vector.broadcast %315 : vector<16x1xf32> to vector<16x32xf32>
    %317 = arith.subf %311, %316 : vector<16x32xf32>
    %318 = arith.mulf %317, %317 : vector<16x32xf32>
    %cst_123 = arith.constant dense<0.000000e+00> : vector<16xf32>
    %319 = vector.multi_reduction <add>, %318, %cst_123 [1] : vector<16x32xf32> to vector<16xf32>
    %320 = vector.shape_cast %319 : vector<16xf32> to vector<16x1xf32>
    %cst_124 = arith.constant 3.200000e+01 : f32
    %321 = vector.broadcast %cst_124 : f32 to vector<16x1xf32>
    %322 = arith.divf %320, %321 : vector<16x1xf32>
    %cst_125 = arith.constant 9.99999974E-6 : f32
    %323 = vector.broadcast %cst_125 : f32 to vector<16x1xf32>
    %324 = arith.addf %322, %323 : vector<16x1xf32>
    %325 = math.rsqrt %324 : vector<16x1xf32>
    %326 = vector.broadcast %325 : vector<16x1xf32> to vector<16x32xf32>
    %327 = arith.mulf %317, %326 : vector<16x32xf32>
    %328 = vector.broadcast %188 : vector<1x32xf32> to vector<16x32xf32>
    %329 = arith.mulf %327, %328 : vector<16x32xf32>
    %330 = vector.broadcast %190 : vector<1x32xf32> to vector<16x32xf32>
    %331 = arith.addf %329, %330 : vector<16x32xf32>
    %c0_126 = arith.constant 0 : index
    %c0_127 = arith.constant 0 : index
    %332 = vector.load %arg4[%c0_126, %c0_127] : memref<16x32xf32, #tpu.memory_space<vmem>>, vector<16x32xf32>
    tpu.vector_store %arg4[%c0_126, %c0_127], %331 {strides = array<i32>} : memref<16x32xf32, #tpu.memory_space<vmem>>, vector<16x32xf32>,
    return
  }
}

</mosaic_0001>

<bundles_post_ra>
// kernel: encoder_forward.1
= control target key start
LH: loop header
LB: loop body
LE: loop exit
PB: predicated region body
PF: predicated region fallthrough
CT: control target
= control target key end

     0   :  { %9 = vsyncpa [#allocation3], 0  ;;  %s2710_s0 = inlined_call_operand.vmem [shape: f32[16,16], index: 0, kind: input, shape index: {}]   ;;  %s2711_s1 = inlined_call_operand.vmem [shape: f32[16,32], index: 1, kind: input, shape index: {}]   ;;  %s2712_s2 = inlined_call_operand.hbm [shape: bf16[2,160,96], index: 2, kind: input, shape index: {}]   ;;  %s2713_s3 = inlined_call_operand.vmem [shape: f32[2,8,96], index: 3, kind: input, shape index: {}]   ;;  %s2714_s4 = inlined_call_operand.hbm [shape: f32[16,32], index: 4, kind: output, shape index: {}]  }
   0x1   :  { %10 = vsyncpa [#allocation4], 0  ;;  %s2314_s15 = smov [#allocation2]  }
   0x2   :  { %s20_s16 = sshll.u32 %s2314_s15, 4  ;;  %s21_s16 = int_to_ptr.vmem [resolvable:$true] %s20_s16 }
   0x3   :  { %s2278_s17 = scalar_lea.vmem %s21_s16, 2560  ;;  %p2283_p1 = scmp.lt.s32.totalorder %s21_s16, %s21_s16 }
   0x4   :  { %p2279_p0 = scmp.ne.s32.totalorder %s21_s16, %s2278_s17  ;;  %p2284_p2 = scmp.lt.s32.totalorder %s2278_s17, %s2278_s17 }
   0x6   :  { %p2285_p3 = por %p2284_p2, %p2283_p1 }
   0x8   :  { %p2286_p4 = pnand %p2285_p3, %p2279_p0 }
   0xa   :  { %2289 = shalt.err (!%p2286_p4)
}
   0xb   :  { %s2315_s18 = smov 64   ;;  %s2316_s19 = smov 4  }
   0xc   :  { %26 = dma.hbm_to_vmem [thread:$0]  %s2712_s2, 2560, %s21_s16, [#allocation3], %s2315_s18, %s2315_s18, %s2316_s19  }
   0xd   :  { %2310 = dma.done.wait [#allocation3], 2560  }
   0xe   :  { %2311 = vsyncadd [#allocation3], 4294964736  ;;  %v2317_v0 = vmov 0.0   ;;  %vm2318_vm0 = vmmov 0   ;;  %v2170_v1 = vld [vmem:[#allocation2 + $0x8] sm:$0xff]   ;;  %v2171_v2 = vld [vmem:[#allocation2] sm:$0xff]  }
   0xf   :  { %1952 = vmatprep.subr.bf16.mxu1 %v2317_v0  ;;  %1956 = vmatprep.mubr.msk.bf16.mxu1 %vm2318_vm0, %v2317_v0  ;;  %v2373_v3 = vld [vmem:[%s2711_s1] sm:$0xff]  ;;  %v2378_v4 = vld [vmem:[%s2711_s1 + $0x8] sm:$0xff]  ;;  %vm82_vm1 = vcmask 261120   ;;  %s2319_s1 = smov 120   ;;  %s2320_s27 = smov 96   ;;  %vm131_vm2 = vcmask 64512  }
  0x10   :  { %1966 = vmatprep.subr.bf16.mxu0 %v2317_v0  ;;  %1968 = vmatprep.mubr.msk.bf16.mxu0 %vm2318_vm0, %v2317_v0  ;;  %v65_v5 = vpack.c.bf16 %v2378_v4, %v2373_v3  ;;  %v1824_v7 = vld [vmem:[%s2713_s3] ss:$0 sm:$0xff]  ;;  %s2321_s28 = smov 80   ;;  %s2322_s29 = smov 88   ;;  %vm179_vm3 = vcmask 130048   ;;  %v2436_v29 = vld [vmem:[%s2710_s0 + $0x8] sm:$0xff] }
  0x11   :  { %1953 = vmatpush3.bf16.msra.mxu1 %v2170_v1  ;;  %s2323_s30 = smov 72   ;;  %s2324_s5 = smov 112   ;;  %v2430_v25 = vld [vmem:[%s2710_s0] sm:$0xff]  ;;  %vm641_vm4 = vcmask 195584   ;;  %vm838_vm5 = vcmask 523264  }
  0x12   :  { %1954 = vmatprep.subr.bf16.mxu1 %v2317_v0  ;;  %s2325_s6 = smov 104   ;;  %s2326_s0 = smov 56  }
  0x13   :  { %s2327_s11 = smov 48   ;;  %s2328_s12 = smov 40  }
  0x14   :  { %s2329_s13 = smov 8   ;;  %s2330_s14 = smov 16  }
  0x15   :  { %1955 = vmatpush3.bf16.msra.mxu1 %v2171_v2  ;;  %s2331_s15 = smov 24   ;;  %s2332_s19 = smov [#allocation5]  }
  0x16   :  { %1960 = vmatprep.subr.bf16.mxu1 %v2317_v0  ;;  %s1812_s20 = sshll.u32 %s2332_s19, 4  ;;  %s1813_s20 = int_to_ptr.vmem [resolvable:$true] %s1812_s20 }
  0x17   :  { %s2290_s21 = scalar_lea.vmem %s1813_s20, 256  ;;  %p2295_p6 = scmp.lt.s32.totalorder %s1813_s20, %s1813_s20 }
  0x18   :  { %1957 = vmatmul.mubr.msk.bf16.vlgmr.msra.gmra.mxu1 %vm82_vm1, %v65_v5  ;;  %p2291_p5 = scmp.ne.s32.totalorder %s1813_s20, %s2290_s21  ;;  %p2296_p7 = scmp.lt.s32.totalorder %s2290_s21, %s2290_s21 }
  0x19   :  { %1962 = vmatprep.mubr.msk.bf16.mxu1 %vm2318_vm0, %v2317_v0 }
  0x1a   :  { %p2297_p8 = por %p2296_p7, %p2295_p6 }
  0x1c   :  { %p2298_p9 = pnand %p2297_p8, %p2291_p5 }
  0xd8   :  { %v120_v6 = vpop.f32.mrf.mxu1 }
  0xd9   :  { %v121_v10 = vadd.f32 %v1824_v7, %v120_v6 }
  0xda   :  { %v1958_v8 = vpop.f32.mrf.mxu1 }
  0xdc   :  { %v123_v9 = vpop.f32.mrf.mxu1 }
  0xdd   :  { %v124_v11 = vadd.f32 %v1824_v7, %v123_v9 }
  0xde   :  { %v1959_v12 = vpop.f32.mrf.mxu1 }
  0xdf   :  { %v2390_v13 = vpack.c.bf16 %v124_v11, %v121_v10 }
  0xe1   :  { %250 = vrot.lane.b32.xlu1 %v2390_v13, %s2319_s1  ;;  %129 = vrot.lane.b32.xlu0 %v2390_v13, %s2320_s27 }
  0xe5   :  { %373 = vrot.lane.b32.xlu1 %v2390_v13, %s2321_s28  ;;  %252 = vrot.lane.b32.xlu0 %v2390_v13, %s2322_s29 }
  0xe9   :  { %494 = vrot.lane.b32.xlu1 %v2390_v13, %s2323_s30  ;;  %371 = vrot.lane.b32.xlu0 %v2390_v13, %s2324_s5 }
  0xed   :  { %492 = vrot.lane.b32.xlu0 %v2390_v13, %s2325_s6 }
 0x153   :  { %v130_v14 = vpop.permute.xlu0 %129  ;;  %v251_v17 = vpop.permute.xlu1 %250 }
 0x154   :  { %v136_v15 = vsel %vm131_vm2, %v130_v14, 0 }
 0x155   :  { %1961 = vmatpush3.bf16.xpose.msra.mxu1 %v136_v15 }
 0x156   :  { %1972 = vmatprep.subr.bf16.mxu1 %v2317_v0 }
 0x157   :  { %v253_v16 = vpop.permute.xlu0 %252  ;;  %v374_v19 = vpop.permute.xlu1 %373 }
 0x158   :  { %v258_v18 = vsel %vm131_vm2, %v253_v16, 0  ;;  %v379_v20 = vsel %vm131_vm2, %v374_v19, 0 }
 0x15b   :  { %v495_v21 = vpop.permute.xlu1 %494  ;;  %v372_v22 = vpop.permute.xlu0 %371 }
 0x15c   :  { %1963 = vmatmul.mubr.msk.bf16.vlgmr.msra.gmra.mxu1 %vm131_vm2, %v2390_v13  ;;  %v500_v23 = vsel %vm131_vm2, %v495_v21, 0 }
 0x15d   :  { %1973 = vmatpush3.bf16.xpose.msra.mxu1 %v258_v18  ;;  %1974 = vmatprep.mubr.msk.bf16.mxu1 %vm2318_vm0, %v2317_v0 }
 0x15e   :  { %1984 = vmatprep.subr.bf16.mxu1 %v2317_v0 }
 0x15f   :  { %v493_v24 = vpop.permute.xlu0 %492 }
 0x164   :  { %1975 = vmatmul.mubr.msk.bf16.vlgmr.msra.gmra.mxu1 %vm131_vm2, %v251_v17 }
 0x165   :  { %1985 = vmatpush3.bf16.xpose.msra.mxu1 %v379_v20  ;;  %1986 = vmatprep.mubr.msk.bf16.mxu1 %vm2318_vm0, %v2317_v0 }
 0x166   :  { %1996 = vmatprep.subr.bf16.mxu1 %v2317_v0 }
 0x16c   :  { %1987 = vmatmul.mubr.msk.bf16.vlgmr.msra.gmra.mxu1 %vm131_vm2, %v372_v22 }
 0x16d   :  { %1997 = vmatpush3.bf16.xpose.msra.mxu1 %v500_v23  ;;  %1998 = vmatprep.mubr.msk.bf16.mxu1 %vm2318_vm0, %v2317_v0 }
 0x16e   :  { %2008 = vmatprep.subr.bf16.mxu1 %v2317_v0 }
 0x174   :  { %1999 = vmatmul.mubr.msk.bf16.vlgmr.msra.gmra.mxu1 %vm131_vm2, %v493_v24 }
 0x175   :  { %2012 = vmatprep.mubr.msk.bf16.mxu1 %vm2318_vm0, %v2317_v0 }
 0x21c   :  { %v172_v26 = vpop.f32.mrf.mxu1 }
 0x21d   :  { %v173_v27 = vadd.f32 %v172_v26, %v2430_v25 }
 0x21e   :  { %v1964_v28 = vpop.f32.mrf.mxu1 }
 0x21f   :  { %v180_v30 = vsel %vm179_vm3, %v173_v27, -inf }
 0x220   :  { %181 = vmax.xlane.f32.xlu1 %v180_v30  ;;  %v175_v31 = vpop.f32.mrf.mxu1 }
 0x221   :  { %v176_v32 = vadd.f32 %v175_v31, %v2436_v29 }
 0x222   :  { %v1965_v33 = vpop.f32.mrf.mxu1 }
 0x223   :  { %v183_v34 = vsel %vm179_vm3, %v176_v32, -inf }
 0x224   :  { %184 = vmax.xlane.f32.xlu0 %v183_v34  ;;  %v294_v35 = vpop.f32.mrf.mxu1 }
 0x225   :  { %v295_v36 = vadd.f32 %v294_v35, %v2430_v25 }
 0x226   :  { %v1976_v37 = vpop.f32.mrf.mxu1 }
 0x227   :  { %v301_v38 = vsel %vm179_vm3, %v295_v36, -inf }
 0x228   :  { %302 = vmax.xlane.f32.xlu0 %v301_v38  ;;  %v297_v39 = vpop.f32.mrf.mxu1 }
 0x229   :  { %v298_v40 = vadd.f32 %v297_v39, %v2436_v29 }
 0x22a   :  { %v1977_v41 = vpop.f32.mrf.mxu1 }
 0x22b   :  { %v304_v42 = vsel %vm179_vm3, %v298_v40, -inf }
 0x22c   :  { %305 = vmax.xlane.f32.xlu1 %v304_v42  ;;  %v415_v43 = vpop.f32.mrf.mxu1 }
 0x22d   :  { %v416_v44 = vadd.f32 %v415_v43, %v2430_v25 }
 0x22e   :  { %v1988_v45 = vpop.f32.mrf.mxu1 }
 0x22f   :  { %v422_v46 = vsel %vm179_vm3, %v416_v44, -inf }
 0x230   :  { %423 = vmax.xlane.f32.xlu0 %v422_v46  ;;  %v418_v47 = vpop.f32.mrf.mxu1 }
 0x231   :  { %v419_v48 = vadd.f32 %v418_v47, %v2436_v29 }
 0x232   :  { %v1989_v49 = vpop.f32.mrf.mxu1 }
 0x233   :  { %v425_v50 = vsel %vm179_vm3, %v419_v48, -inf }
 0x234   :  { %426 = vmax.xlane.f32.xlu1 %v425_v50  ;;  %v536_v51 = vpop.f32.mrf.mxu1 }
 0x235   :  { %v537_v52 = vadd.f32 %v536_v51, %v2430_v25 }
 0x236   :  { %v2000_v53 = vpop.f32.mrf.mxu1 }
 0x237   :  { %v543_v54 = vsel %vm179_vm3, %v537_v52, -inf }
 0x238   :  { %544 = vmax.xlane.f32.xlu0 %v543_v54  ;;  %v539_v55 = vpop.f32.mrf.mxu1 }
 0x239   :  { %v540_v56 = vadd.f32 %v539_v55, %v2436_v29 }
 0x23a   :  { %v2001_v57 = vpop.f32.mrf.mxu1 }
 0x23b   :  { %v546_v58 = vsel %vm179_vm3, %v540_v56, -inf }
 0x23c   :  { %547 = vmax.xlane.f32.xlu1 %v546_v58 }
 0x2a9   :  { %v182_v59 = vpop.xlane.xlu1 %181 }
 0x2aa   :  { %v186_v60 = vsub.f32 %v173_v27, %v182_v59 }
 0x2ac   :  { %v188_v61 = vmul.f32 1.442695, %v186_v60 }
 0x2ad   :  { %v185_v62 = vpop.xlane.xlu0 %184 }
 0x2ae   :  { %2190 = vpow2.f32 %v188_v61  ;;  %v187_v63 = vsub.f32 %v176_v32, %v185_v62 }
 0x2b0   :  { %v190_v1 = vmul.f32 1.442695, %v187_v63 }
 0x2b1   :  { %v303_v2 = vpop.xlane.xlu0 %302 }
 0x2b2   :  { %2192 = vpow2.f32 %v190_v1  ;;  %v307_v5 = vsub.f32 %v295_v36, %v303_v2 }
 0x2b4   :  { %v309_v6 = vmul.f32 1.442695, %v307_v5 }
 0x2b5   :  { %v306_v14 = vpop.xlane.xlu1 %305 }
 0x2b6   :  { %2194 = vpow2.f32 %v309_v6  ;;  %v308_v15 = vsub.f32 %v298_v40, %v306_v14 }
 0x2b8   :  { %v311_v19 = vmul.f32 1.442695, %v308_v15 }
 0x2b9   :  { %v424_v16 = vpop.xlane.xlu0 %423 }
 0x2ba   :  { %v428_v18 = vsub.f32 %v416_v44, %v424_v16  ;;  %2196 = vpow2.f32 %v311_v19  ;;  %v2172_v19 = vld [vmem:[#allocation2 + $0x18] sm:$0xff]  }
 0x2bb   :  { %v2191_v7 = vpop.eup %2190  ;;  %2009 = vmatpush3.bf16.msra.mxu1 %v2172_v19 }
 0x2bc   :  { %v192_v8 = vsel %vm179_vm3, %v2191_v7, 0.0  ;;  %v430_v23 = vmul.f32 1.442695, %v428_v18  ;;  %2010 = vmatprep.subr.bf16.mxu1 %v2317_v0 }
 0x2bd   :  { %193 = vadd.xlane.f32.xlu0 %v192_v8  ;;  %v427_v17 = vpop.xlane.xlu1 %426 }
 0x2be   :  { %v429_v20 = vsub.f32 %v419_v48, %v427_v17  ;;  %2198 = vpow2.f32 %v430_v23 }
 0x2bf   :  { %v2193_v9 = vpop.eup %2192 }
 0x2c0   :  { %v195_v10 = vsel %vm179_vm3, %v2193_v9, 0.0  ;;  %v432_v26 = vmul.f32 1.442695, %v429_v20 }
 0x2c1   :  { %196 = vadd.xlane.f32.xlu1 %v195_v10  ;;  %v545_v21 = vpop.xlane.xlu0 %544 }
 0x2c2   :  { %v549_v24 = vsub.f32 %v537_v52, %v545_v21  ;;  %2200 = vpow2.f32 %v432_v26 }
 0x2c3   :  { %v2455_v11 = vpop.eup %2194 }
 0x2c4   :  { %v313_v12 = vsel %vm179_vm3, %v2455_v11, 0.0  ;;  %v551_v28 = vmul.f32 1.442695, %v549_v24  ;;  %v2173_v24 = vld [vmem:[#allocation2 + $0x10] sm:$0xff]  }
 0x2c5   :  { %314 = vadd.xlane.f32.xlu0 %v313_v12  ;;  %v548_v22 = vpop.xlane.xlu1 %547  ;;  %2011 = vmatpush3.bf16.msra.mxu1 %v2173_v24  ;;  %v1841_v24 = vld [vmem:[%s2713_s3 + $0x3] ss:$0 sm:$0xff] }
 0x2c6   :  { %v550_v27 = vsub.f32 %v540_v56, %v548_v22  ;;  %2202 = vpow2.f32 %v551_v28  ;;  %2024 = vmatprep.subr.bf16.mxu1 %v2317_v0 }
 0x2c7   :  { %v2197_v31 = vpop.eup %2196 }
 0x2c8   :  { %v553_v30 = vmul.f32 1.442695, %v550_v27  ;;  %v316_v33 = vsel %vm179_vm3, %v2197_v31, 0.0 }
 0x2ca   :  { %2204 = vpow2.f32 %v553_v30 }
 0x2cb   :  { %v2199_v32 = vpop.eup %2198 }
 0x2cc   :  { %v434_v36 = vsel %vm179_vm3, %v2199_v32, 0.0 }
 0x2cf   :  { %v2201_v34 = vpop.eup %2200 }
 0x2d0   :  { %v437_v37 = vsel %vm179_vm3, %v2201_v34, 0.0 }
 0x2d2   :  { %324 = vrot.lane.b32.xlu1 %v2390_v13, %s2326_s0 }
 0x2d3   :  { %v2464_v35 = vpop.eup %2202 }
 0x2d4   :  { %v555_v39 = vsel %vm179_vm3, %v2464_v35, 0.0 }
 0x2d7   :  { %v2205_v38 = vpop.eup %2204 }
 0x2d8   :  { %v558_v40 = vsel %vm179_vm3, %v2205_v38, 0.0 }
 0x2db   :  { %203 = vrot.lane.b32.xlu0 %v2390_v13, %s2315_s18 }
 0x2f6   :  { %317 = vadd.xlane.f32.xlu1 %v316_v33 }
 0x2fa   :  { %435 = vadd.xlane.f32.xlu0 %v434_v36  ;;  %438 = vadd.xlane.f32.xlu1 %v437_v37 }
 0x2fe   :  { %556 = vadd.xlane.f32.xlu0 %v555_v39  ;;  %559 = vadd.xlane.f32.xlu1 %v558_v40 }
 0x30f   :  { %445 = vrot.lane.b32.xlu1 %v2390_v13, %s2327_s11 }
 0x314   :  { %566 = vrot.lane.b32.xlu0 %v2390_v13, %s2328_s12 }
 0x346   :  { %v194_v41 = vpop.xlane.xlu0 %193 }
 0x347   :  { %2206 = vrcp.f32 %v194_v41 }
 0x34a   :  { %v197_v42 = vpop.xlane.xlu1 %196 }
 0x34b   :  { %2208 = vrcp.f32 %v197_v42 }
 0x34e   :  { %v315_v43 = vpop.xlane.xlu0 %314  ;;  %v325_v50 = vpop.permute.xlu1 %324 }
 0x34f   :  { %2210 = vrcp.f32 %v315_v43 }
 0x352   :  { %v204_v44 = vpop.permute.xlu0 %203 }
 0x353   :  { %1967 = vmatpush3.bf16.msra.mxu0 %v204_v44 }
 0x354   :  { %1978 = vmatprep.subr.bf16.mxu0 %v2317_v0  ;;  %v2207_v45 = vpop.eup %2206 }
 0x355   :  { %v200_v47 = vmul.f32 %v2207_v45, %v2191_v7 }
 0x358   :  { %v2209_v46 = vpop.eup %2208 }
 0x359   :  { %v201_v48 = vmul.f32 %v2209_v46, %v2193_v9 }
 0x35b   :  { %v202_v49 = vpack.c.bf16 %v201_v48, %v200_v47 }
 0x35c   :  { %v2211_v55 = vpop.eup %2210 }
 0x35d   :  { %1969 = vmatmul.mubr.msk.bf16.vlgmr.msra.gmra.mxu0 %vm179_vm3, %v202_v49  ;;  %v321_v57 = vmul.f32 %v2211_v55, %v2455_v11 }
 0x35e   :  { %1979 = vmatpush3.bf16.msra.mxu0 %v325_v50  ;;  %1980 = vmatprep.mubr.msk.bf16.mxu0 %vm2318_vm0, %v2317_v0 }
 0x35f   :  { %1990 = vmatprep.subr.bf16.mxu0 %v2317_v0 }
 0x37f   :  { %v318_v13 = vpop.xlane.xlu1 %317 }
 0x380   :  { %2212 = vrcp.f32 %v318_v13  ;;  %v1836_v13 = vld [vmem:[%s2713_s3 + $0x1] ss:$0 sm:$0xff] }
 0x383   :  { %v436_v51 = vpop.xlane.xlu0 %435  ;;  %v439_v52 = vpop.xlane.xlu1 %438 }
 0x384   :  { %2214 = vrcp.f32 %v436_v51 }
 0x385   :  { %2216 = vrcp.f32 %v439_v52 }
 0x387   :  { %v557_v53 = vpop.xlane.xlu0 %556  ;;  %v560_v54 = vpop.xlane.xlu1 %559 }
 0x388   :  { %2218 = vrcp.f32 %v557_v53 }
 0x389   :  { %2220 = vrcp.f32 %v560_v54 }
 0x38b   :  { %v446_v62 = vpop.permute.xlu1 %445  ;;  %v567_v7 = vpop.permute.xlu0 %566 }
 0x38d   :  { %v2213_v56 = vpop.eup %2212 }
 0x38e   :  { %v322_v58 = vmul.f32 %v2213_v56, %v2197_v31 }
 0x390   :  { %v323_v59 = vpack.c.bf16 %v322_v58, %v321_v57 }
 0x391   :  { %v2215_v60 = vpop.eup %2214 }
 0x392   :  { %v2217_v61 = vpop.eup %2216  ;;  %1981 = vmatmul.mubr.msk.bf16.vlgmr.msra.gmra.mxu0 %vm179_vm3, %v323_v59  ;;  %v442_v63 = vmul.f32 %v2215_v60, %v2199_v32 }
 0x393   :  { %1991 = vmatpush3.bf16.msra.mxu0 %v446_v62  ;;  %1992 = vmatprep.mubr.msk.bf16.mxu0 %vm2318_vm0, %v2317_v0  ;;  %v443_v1 = vmul.f32 %v2217_v61, %v2201_v34 }
 0x394   :  { %2002 = vmatprep.subr.bf16.mxu0 %v2317_v0 }
 0x395   :  { %v2219_v2 = vpop.eup %2218  ;;  %v444_v5 = vpack.c.bf16 %v443_v1, %v442_v63 }
 0x396   :  { %v2221_v6 = vpop.eup %2220  ;;  %v563_v8 = vmul.f32 %v2219_v2, %v2464_v35 }
 0x397   :  { %v564_v9 = vmul.f32 %v2221_v6, %v2205_v38 }
 0x399   :  { %v565_v10 = vpack.c.bf16 %v564_v9, %v563_v8  ;;  %v2174_v9 = vld [vmem:[#allocation2 + $0x28] sm:$0xff]  }
 0x39a   :  { %1993 = vmatmul.mubr.msk.bf16.vlgmr.msra.gmra.mxu0 %vm179_vm3, %v444_v5 }
 0x39b   :  { %2003 = vmatpush3.bf16.msra.mxu0 %v567_v7  ;;  %2004 = vmatprep.mubr.msk.bf16.mxu0 %vm2318_vm0, %v2317_v0 }
 0x39c   :  { %2016 = vmatprep.subr.bf16.mxu0 %v2317_v0 }
 0x3a2   :  { %2005 = vmatmul.mubr.msk.bf16.vlgmr.msra.gmra.mxu0 %vm179_vm3, %v565_v10  ;;  %v2176_v10 = vld [vmem:[#allocation2 + $0x48] sm:$0xff]  }
 0x3a3   :  { %2020 = vmatprep.mubr.msk.bf16.mxu0 %vm2318_vm0, %v2317_v0  ;;  %2017 = vmatpush3.bf16.msra.mxu0 %v2174_v9 }
 0x3a4   :  { %2018 = vmatprep.subr.bf16.mxu0 %v2317_v0 }
 0x41d   :  { %v243_v11 = vpop.f32.mrf.mxu0 }
 0x41f   :  { %v1970_v12 = vpop.f32.mrf.mxu0 }
 0x421   :  { %v246_v14 = vpop.f32.mrf.mxu0 }
 0x423   :  { %v1971_v15 = vpop.f32.mrf.mxu0 }
 0x452   :  { %v364_v16 = vpop.f32.mrf.mxu0 }
 0x454   :  { %v1982_v17 = vpop.f32.mrf.mxu0 }
 0x456   :  { %v367_v18 = vpop.f32.mrf.mxu0 }
 0x457   :  { %v2140_v20 = vpack.i.bf16 %v367_v18, %v364_v16 }
 0x458   :  { %v1983_v21 = vpop.f32.mrf.mxu0 }
 0x459   :  { %2141 = vrot.lane.b32.xlu1 %v2140_v20, %s2329_s13  ;;  %v1840_v20 = vld [vmem:[%s2713_s3 + $0x2] ss:$0 sm:$0xff] }
 0x45a   :  { %v485_v22 = vpop.f32.mrf.mxu0 }
 0x45c   :  { %v1994_v23 = vpop.f32.mrf.mxu0 }
 0x45e   :  { %v488_v26 = vpop.f32.mrf.mxu0 }
 0x45f   :  { %v2145_v27 = vpack.i.bf16 %v488_v26, %v485_v22 }
 0x460   :  { %v1995_v28 = vpop.f32.mrf.mxu0 }
 0x461   :  { %2146 = vrot.lane.b32.xlu0 %v2145_v27, %s2330_s14 }
 0x462   :  { %v606_v30 = vpop.f32.mrf.mxu0 }
 0x464   :  { %v2006_v31 = vpop.f32.mrf.mxu0 }
 0x465   :  { %v2177_v31 = vld [vmem:[#allocation2 + $0x40] sm:$0xff]  }
 0x466   :  { %v609_v32 = vpop.f32.mrf.mxu0 }
 0x467   :  { %v2150_v33 = vpack.i.bf16 %v609_v32, %v606_v30  ;;  %v2178_v32 = vld [vmem:[#allocation2 + $0x38] sm:$0xff]  }
 0x468   :  { %v2007_v34 = vpop.f32.mrf.mxu0 }
 0x469   :  { %2151 = vrot.lane.b32.xlu1 %v2150_v33, %s2331_s15  ;;  %v2179_v33 = vld [vmem:[#allocation2 + $0x30] sm:$0xff]   ;;  %v1842_v34 = vld [vmem:[%s2713_s3 + $0x4] ss:$0 sm:$0xff] }
 0x4cb   :  { %v2142_v35 = vpop.permute.xlu1 %2141 }
 0x4cc   :  { %v2144_v37 = vunpack.i.h.bf16 %v2142_v35  ;;  %v2143_v38 = vunpack.i.l.bf16 %v2142_v35 }
 0x4ce   :  { %v638_v42 = vsel %vm131_vm2, %v246_v14, %v2144_v37  ;;  %v637_v43 = vsel %vm131_vm2, %v243_v11, %v2143_v38 }
 0x4d3   :  { %v2147_v36 = vpop.permute.xlu0 %2146 }
 0x4d4   :  { %v2149_v39 = vunpack.i.h.bf16 %v2147_v36  ;;  %v2148_v40 = vunpack.i.l.bf16 %v2147_v36 }
 0x4d6   :  { %v639_v46 = vsel %vm179_vm3, %v637_v43, %v2148_v40  ;;  %v640_v47 = vsel %vm179_vm3, %v638_v42, %v2149_v39 }
 0x4db   :  { %v2152_v41 = vpop.permute.xlu1 %2151 }
 0x4dc   :  { %v2154_v44 = vunpack.i.h.bf16 %v2152_v41  ;;  %v2153_v45 = vunpack.i.l.bf16 %v2152_v41 }
 0x4de   :  { %v642_v48 = vsel %vm641_vm4, %v639_v46, %v2153_v45  ;;  %v643_v49 = vsel %vm641_vm4, %v640_v47, %v2154_v44  ;;  %v1846_v44 = vld [vmem:[%s2713_s3 + $0x5] ss:$0 sm:$0xff] }
 0x4df   :  { %v644_v50 = vpack.c.bf16 %v643_v49, %v642_v48 }
 0x4e1   :  { %2013 = vmatmul.mubr.msk.bf16.vlgmr.msra.gmra.mxu1 %vm82_vm1, %v644_v50 }
 0x4e2   :  { %2032 = vmatprep.mubr.msk.bf16.mxu1 %vm2318_vm0, %v2317_v0  ;;  %2025 = vmatpush3.bf16.msra.mxu1 %v2176_v10 }
 0x4e3   :  { %2026 = vmatprep.subr.bf16.mxu1 %v2317_v0 }
 0x4e6   :  { %2027 = vmatpush3.bf16.msra.mxu1 %v2177_v31 }
 0x4e7   :  { %2028 = vmatprep.subr.bf16.mxu1 %v2317_v0 }
 0x4ea   :  { %2029 = vmatpush3.bf16.msra.mxu1 %v2178_v32 }
 0x4eb   :  { %2030 = vmatprep.subr.bf16.mxu1 %v2317_v0 }
 0x4ee   :  { %2031 = vmatpush3.bf16.msra.mxu1 %v2179_v33 }
 0x4ef   :  { %2050 = vmatprep.subr.bf16.mxu1 %v2317_v0 }
 0x5a1   :  { %v698_v51 = vpop.f32.mrf.mxu1 }
 0x5a2   :  { %v699_v52 = vadd.f32 %v1836_v13, %v698_v51 }
 0x5a3   :  { %v2014_v53 = vpop.f32.mrf.mxu1 }
 0x5a4   :  { %v705_v54 = vadd.f32 %v699_v52, %v2373_v3 }
 0x5a5   :  { %v701_v55 = vpop.f32.mrf.mxu1 }
 0x5a6   :  { %v702_v56 = vadd.f32 %v1836_v13, %v701_v55  ;;  %v707_v57 = vsel %vm82_vm1, %v705_v54, 0.0 }
 0x5a7   :  { %708 = vadd.xlane.f32.xlu0 %v707_v57  ;;  %v2015_v58 = vpop.f32.mrf.mxu1 }
 0x5a8   :  { %v706_v59 = vadd.f32 %v702_v56, %v2378_v4  ;;  %v2175_v4 = vld [vmem:[#allocation2 + $0x20] sm:$0xff]  }
 0x5a9   :  { %2019 = vmatpush3.bf16.msra.mxu0 %v2175_v4 }
 0x5aa   :  { %v710_v60 = vsel %vm82_vm1, %v706_v59, 0.0  ;;  %2036 = vmatprep.subr.bf16.mxu0 %v2317_v0 }
 0x5ab   :  { %711 = vadd.xlane.f32.xlu1 %v710_v60 }
 0x630   :  { %v709_v61 = vpop.xlane.xlu0 %708 }
 0x631   :  { %v714_v62 = vmul.f32 0.03125, %v709_v61 }
 0x633   :  { %v716_v63 = vsub.f32 %v705_v54, %v714_v62 }
 0x634   :  { %v712_v1 = vpop.xlane.xlu1 %711 }
 0x635   :  { %v715_v2 = vmul.f32 0.03125, %v712_v1  ;;  %v718_v5 = vmul.f32 %v716_v63, %v716_v63  ;;  %v2180_v1 = vld [vmem:[#allocation2 + $0x58] sm:$0xff]  }
 0x637   :  { %v717_v6 = vsub.f32 %v706_v59, %v715_v2  ;;  %v720_v3 = vsel %vm82_vm1, %v718_v5, 0.0  ;;  %v2181_v2 = vld [vmem:[#allocation2 + $0x50] sm:$0xff]  }
 0x638   :  { %721 = vadd.xlane.f32.xlu0 %v720_v3 }
 0x639   :  { %v719_v7 = vmul.f32 %v717_v6, %v717_v6 }
 0x63b   :  { %v723_v8 = vsel %vm82_vm1, %v719_v7, 0.0 }
 0x63c   :  { %724 = vadd.xlane.f32.xlu0 %v723_v8 }
 0x6c1   :  { %v722_v11 = vpop.xlane.xlu0 %721 }
 0x6c2   :  { %v726_v12 = vmul.f32 0.03125, %v722_v11  ;;  %v1852_v11 = vld [vmem:[%s2713_s3 + $0x6] ss:$0 sm:$0xff] }
 0x6c4   :  { %v728_v14 = vadd.f32 1e-05, %v726_v12 }
 0x6c5   :  { %v725_v15 = vpop.xlane.xlu0 %724 }
 0x6c6   :  { %2222 = vrsqrt.f32 %v728_v14  ;;  %v727_v16 = vmul.f32 0.03125, %v725_v15 }
 0x6c8   :  { %v729_v17 = vadd.f32 1e-05, %v727_v16  ;;  %v1853_v16 = vld [vmem:[%s2713_s3 + $0x7] ss:$0 sm:$0xff] }
 0x6ca   :  { %2224 = vrsqrt.f32 %v729_v17 }
 0x6d3   :  { %v2223_v18 = vpop.eup %2222 }
 0x6d4   :  { %v732_v19 = vmul.f32 %v2223_v18, %v716_v63 }
 0x6d6   :  { %v738_v23 = vmul.f32 %v1840_v20, %v732_v19 }
 0x6d7   :  { %v2225_v21 = vpop.eup %2224 }
 0x6d8   :  { %v733_v22 = vmul.f32 %v2225_v21, %v717_v6  ;;  %v744_v27 = vadd.f32 %v1841_v24, %v738_v23 }
 0x6da   :  { %v739_v26 = vmul.f32 %v1840_v20, %v733_v22  ;;  %v1862_v22 = vld [vmem:[%s2713_s3 + $0x8] ss:$0 sm:$0xff] }
 0x6dc   :  { %v745_v28 = vadd.f32 %v1841_v24, %v739_v26 }
 0x6de   :  { %v746_v30 = vpack.c.bf16 %v745_v28, %v744_v27 }
 0x6e0   :  { %2021 = vmatmul.mubr.msk.bf16.vlgmr.msra.gmra.mxu0 %vm82_vm1, %v746_v30 }
 0x6e1   :  { %2040 = vmatprep.mubr.msk.bf16.mxu0 %vm2318_vm0, %v2317_v0  ;;  %2037 = vmatpush3.bf16.msra.mxu0 %v2180_v1 }
 0x6e2   :  { %2038 = vmatprep.subr.bf16.mxu0 %v2317_v0 }
 0x6e5   :  { %2039 = vmatpush3.bf16.msra.mxu0 %v2181_v2 }
 0x6e6   :  { %2044 = vmatprep.subr.bf16.mxu0 %v2317_v0 }
 0x7a0   :  { %v800_v35 = vpop.f32.mrf.mxu0 }
 0x7a1   :  { %v801_v37 = vadd.f32 %v1842_v34, %v800_v35 }
 0x7a2   :  { %v2022_v36 = vpop.f32.mrf.mxu0 }
 0x7a3   :  { %v807_v41 = vmax.f32 %v801_v37, 0.0 }
 0x7a4   :  { %v803_v38 = vpop.f32.mrf.mxu0 }
 0x7a5   :  { %v804_v39 = vadd.f32 %v1842_v34, %v803_v38 }
 0x7a6   :  { %v2023_v40 = vpop.f32.mrf.mxu0 }
 0x7a7   :  { %v808_v42 = vmax.f32 %v804_v39, 0.0 }
 0x7a9   :  { %v809_v43 = vpack.c.bf16 %v808_v42, %v807_v41 }
 0x7ab   :  { %2033 = vmatmul.mubr.msk.bf16.vlgmr.msra.gmra.mxu1 %vm838_vm5, %v809_v43 }
 0x7ac   :  { %2052 = vmatprep.mubr.msk.bf16.mxu1 %vm2318_vm0, %v2317_v0 }
 0x86b   :  { %v876_v45 = vpop.f32.mrf.mxu1 }
 0x86c   :  { %v877_v46 = vadd.f32 %v1846_v44, %v876_v45 }
 0x86d   :  { %v2034_v47 = vpop.f32.mrf.mxu1 }
 0x86e   :  { %v883_v48 = vadd.f32 %v877_v46, %v744_v27 }
 0x86f   :  { %v879_v49 = vpop.f32.mrf.mxu1 }
 0x870   :  { %v880_v50 = vadd.f32 %v1846_v44, %v879_v49  ;;  %v885_v13 = vsel %vm82_vm1, %v883_v48, 0.0 }
 0x871   :  { %886 = vadd.xlane.f32.xlu1 %v885_v13  ;;  %v2035_v51 = vpop.f32.mrf.mxu1 }
 0x872   :  { %v884_v52 = vadd.f32 %v880_v50, %v745_v28 }
 0x874   :  { %v888_v53 = vsel %vm82_vm1, %v884_v52, 0.0 }
 0x875   :  { %889 = vadd.xlane.f32.xlu0 %v888_v53 }
 0x8fa   :  { %v887_v54 = vpop.xlane.xlu1 %886 }
 0x8fb   :  { %v891_v55 = vmul.f32 0.03125, %v887_v54 }
 0x8fd   :  { %v893_v56 = vsub.f32 %v883_v48, %v891_v55 }
 0x8fe   :  { %v890_v57 = vpop.xlane.xlu0 %889 }
 0x8ff   :  { %v892_v58 = vmul.f32 0.03125, %v890_v57  ;;  %v895_v59 = vmul.f32 %v893_v56, %v893_v56 }
 0x901   :  { %v894_v60 = vsub.f32 %v884_v52, %v892_v58  ;;  %v897_v61 = vsel %vm82_vm1, %v895_v59, 0.0 }
 0x902   :  { %898 = vadd.xlane.f32.xlu1 %v897_v61 }
 0x903   :  { %v896_v62 = vmul.f32 %v894_v60, %v894_v60 }
 0x905   :  { %v900_v63 = vsel %vm82_vm1, %v896_v62, 0.0 }
 0x906   :  { %901 = vadd.xlane.f32.xlu0 %v900_v63 }
 0x98b   :  { %v899_v5 = vpop.xlane.xlu1 %898 }
 0x98c   :  { %v903_v6 = vmul.f32 0.03125, %v899_v5 }
 0x98e   :  { %v905_v3 = vadd.f32 1e-05, %v903_v6 }
 0x98f   :  { %v902_v7 = vpop.xlane.xlu0 %901 }
 0x990   :  { %2226 = vrsqrt.f32 %v905_v3  ;;  %v904_v8 = vmul.f32 0.03125, %v902_v7 }
 0x992   :  { %v906_v9 = vadd.f32 1e-05, %v904_v8 }
 0x994   :  { %2228 = vrsqrt.f32 %v906_v9 }
 0x99d   :  { %v2227_v4 = vpop.eup %2226 }
 0x99e   :  { %v909_v10 = vmul.f32 %v2227_v4, %v893_v56 }
 0x9a0   :  { %v915_v15 = vmul.f32 %v1852_v11, %v909_v10 }
 0x9a1   :  { %v2229_v12 = vpop.eup %2228 }
 0x9a2   :  { %v910_v14 = vmul.f32 %v2229_v12, %v894_v60  ;;  %v2552_v18 = vadd.f32 %v1853_v16, %v915_v15 }
 0x9a4   :  { %v916_v17 = vmul.f32 %v1852_v11, %v910_v14 }
 0x9a6   :  { %v2554_v19 = vadd.f32 %v1853_v16, %v916_v17 }
 0x9a8   :  { %v953_v20 = vpack.c.bf16 %v2554_v19, %v2552_v18 }
 0x9aa   :  { %2041 = vmatmul.mubr.msk.bf16.vlgmr.msra.gmra.mxu0 %vm82_vm1, %v953_v20 }
 0x9ab   :  { %2046 = vmatprep.mubr.msk.bf16.mxu0 %vm2318_vm0, %v2317_v0 }
 0xa6a   :  { %v1007_v21 = vpop.f32.mrf.mxu0 }
 0xa6b   :  { %v1008_v26 = vadd.f32 %v1862_v22, %v1007_v21 }
 0xa6c   :  { %v2042_v23 = vpop.f32.mrf.mxu0 }
 0xa6e   :  { %v1010_v24 = vpop.f32.mrf.mxu0 }
 0xa6f   :  { %v1011_v27 = vadd.f32 %v1862_v22, %v1010_v24 }
 0xa70   :  { %v2043_v28 = vpop.f32.mrf.mxu0 }
 0xa71   :  { %v2564_v30 = vpack.c.bf16 %v1011_v27, %v1008_v26 }
 0xa73   :  { %1137 = vrot.lane.b32.xlu0 %v2564_v30, %s2322_s29  ;;  %1016 = vrot.lane.b32.xlu1 %v2564_v30, %s2320_s27 }
 0xa77   :  { %1256 = vrot.lane.b32.xlu0 %v2564_v30, %s2324_s5  ;;  %1135 = vrot.lane.b32.xlu1 %v2564_v30, %s2319_s1 }
 0xa7b   :  { %1377 = vrot.lane.b32.xlu0 %v2564_v30, %s2325_s6  ;;  %1258 = vrot.lane.b32.xlu1 %v2564_v30, %s2321_s28 }
 0xa7f   :  { %1379 = vrot.lane.b32.xlu1 %v2564_v30, %s2323_s30 }
 0xae5   :  { %v1017_v31 = vpop.permute.xlu1 %1016  ;;  %v1138_v33 = vpop.permute.xlu0 %1137 }
 0xae6   :  { %v1022_v32 = vsel %vm131_vm2, %v1017_v31, 0  ;;  %v1143_v35 = vsel %vm131_vm2, %v1138_v33, 0 }
 0xae7   :  { %2045 = vmatpush3.bf16.xpose.msra.mxu0 %v1022_v32 }
 0xae8   :  { %2056 = vmatprep.subr.bf16.mxu0 %v2317_v0 }
 0xae9   :  { %v1136_v34 = vpop.permute.xlu1 %1135  ;;  %v1257_v39 = vpop.permute.xlu0 %1256 }
 0xaed   :  { %v1259_v36 = vpop.permute.xlu1 %1258  ;;  %v1378_v41 = vpop.permute.xlu0 %1377 }
 0xaee   :  { %2047 = vmatmul.mubr.msk.bf16.vlgmr.msra.gmra.mxu0 %vm131_vm2, %v2564_v30  ;;  %v1264_v37 = vsel %vm131_vm2, %v1259_v36, 0 }
 0xaef   :  { %2057 = vmatpush3.bf16.xpose.msra.mxu0 %v1143_v35  ;;  %2058 = vmatprep.mubr.msk.bf16.mxu0 %vm2318_vm0, %v2317_v0 }
 0xaf0   :  { %2068 = vmatprep.subr.bf16.mxu0 %v2317_v0 }
 0xaf1   :  { %v1380_v38 = vpop.permute.xlu1 %1379 }
 0xaf2   :  { %v1385_v40 = vsel %vm131_vm2, %v1380_v38, 0 }
 0xaf6   :  { %2059 = vmatmul.mubr.msk.bf16.vlgmr.msra.gmra.mxu0 %vm131_vm2, %v1136_v34 }
 0xaf7   :  { %2069 = vmatpush3.bf16.xpose.msra.mxu0 %v1264_v37  ;;  %2070 = vmatprep.mubr.msk.bf16.mxu0 %vm2318_vm0, %v2317_v0 }
 0xaf8   :  { %2080 = vmatprep.subr.bf16.mxu0 %v2317_v0 }
 0xafe   :  { %2071 = vmatmul.mubr.msk.bf16.vlgmr.msra.gmra.mxu0 %vm131_vm2, %v1257_v39 }
 0xaff   :  { %2081 = vmatpush3.bf16.xpose.msra.mxu0 %v1385_v40  ;;  %2082 = vmatprep.mubr.msk.bf16.mxu0 %vm2318_vm0, %v2317_v0 }
 0xb00   :  { %2092 = vmatprep.subr.bf16.mxu0 %v2317_v0 }
 0xb06   :  { %2083 = vmatmul.mubr.msk.bf16.vlgmr.msra.gmra.mxu0 %vm131_vm2, %v1378_v41 }
 0xb07   :  { %2096 = vmatprep.mubr.msk.bf16.mxu0 %vm2318_vm0, %v2317_v0 }
 0xbae   :  { %v1058_v42 = vpop.f32.mrf.mxu0 }
 0xbaf   :  { %v1059_v43 = vadd.f32 %v1058_v42, %v2430_v25 }
 0xbb0   :  { %v2048_v44 = vpop.f32.mrf.mxu0 }
 0xbb1   :  { %v1065_v45 = vsel %vm179_vm3, %v1059_v43, -inf }
 0xbb2   :  { %1066 = vmax.xlane.f32.xlu1 %v1065_v45  ;;  %v1061_v46 = vpop.f32.mrf.mxu0 }
 0xbb3   :  { %v1062_v47 = vadd.f32 %v1061_v46, %v2436_v29 }
 0xbb4   :  { %v2049_v48 = vpop.f32.mrf.mxu0 }
 0xbb5   :  { %v1068_v49 = vsel %vm179_vm3, %v1062_v47, -inf }
 0xbb6   :  { %1069 = vmax.xlane.f32.xlu0 %v1068_v49  ;;  %v1179_v50 = vpop.f32.mrf.mxu0 }
 0xbb7   :  { %v1180_v13 = vadd.f32 %v1179_v50, %v2430_v25 }
 0xbb8   :  { %v2060_v51 = vpop.f32.mrf.mxu0 }
 0xbb9   :  { %v1186_v52 = vsel %vm179_vm3, %v1180_v13, -inf }
 0xbba   :  { %1187 = vmax.xlane.f32.xlu0 %v1186_v52  ;;  %v1182_v53 = vpop.f32.mrf.mxu0 }
 0xbbb   :  { %v1183_v54 = vadd.f32 %v1182_v53, %v2436_v29 }
 0xbbc   :  { %v2061_v55 = vpop.f32.mrf.mxu0 }
 0xbbd   :  { %v1189_v56 = vsel %vm179_vm3, %v1183_v54, -inf }
 0xbbe   :  { %1190 = vmax.xlane.f32.xlu1 %v1189_v56  ;;  %v1300_v57 = vpop.f32.mrf.mxu0 }
 0xbbf   :  { %v1301_v58 = vadd.f32 %v1300_v57, %v2430_v25 }
 0xbc0   :  { %v2072_v59 = vpop.f32.mrf.mxu0 }
 0xbc1   :  { %v1307_v60 = vsel %vm179_vm3, %v1301_v58, -inf }
 0xbc2   :  { %1308 = vmax.xlane.f32.xlu0 %v1307_v60  ;;  %v1303_v61 = vpop.f32.mrf.mxu0 }
 0xbc3   :  { %v1304_v62 = vadd.f32 %v1303_v61, %v2436_v29 }
 0xbc4   :  { %v2073_v63 = vpop.f32.mrf.mxu0 }
 0xbc5   :  { %v1310_v1 = vsel %vm179_vm3, %v1304_v62, -inf }
 0xbc6   :  { %1311 = vmax.xlane.f32.xlu1 %v1310_v1  ;;  %v1421_v2 = vpop.f32.mrf.mxu0 }
 0xbc7   :  { %v1422_v5 = vadd.f32 %v1421_v2, %v2430_v25 }
 0xbc8   :  { %v2084_v6 = vpop.f32.mrf.mxu0 }
 0xbc9   :  { %v1428_v3 = vsel %vm179_vm3, %v1422_v5, -inf }
 0xbca   :  { %1429 = vmax.xlane.f32.xlu0 %v1428_v3  ;;  %v1424_v7 = vpop.f32.mrf.mxu0 }
 0xbcb   :  { %v1425_v8 = vadd.f32 %v1424_v7, %v2436_v29 }
 0xbcc   :  { %v2085_v9 = vpop.f32.mrf.mxu0 }
 0xbcd   :  { %v1431_v4 = vsel %vm179_vm3, %v1425_v8, -inf }
 0xbce   :  { %1432 = vmax.xlane.f32.xlu1 %v1431_v4 }
 0xc3b   :  { %v1067_v10 = vpop.xlane.xlu1 %1066 }
 0xc3c   :  { %v1071_v11 = vsub.f32 %v1059_v43, %v1067_v10 }
 0xc3e   :  { %v1073_v12 = vmul.f32 1.442695, %v1071_v11 }
 0xc3f   :  { %v1070_v14 = vpop.xlane.xlu0 %1069 }
 0xc40   :  { %2230 = vpow2.f32 %v1073_v12  ;;  %v1072_v15 = vsub.f32 %v1062_v47, %v1070_v14 }
 0xc42   :  { %v1075_v16 = vmul.f32 1.442695, %v1072_v15 }
 0xc43   :  { %v1188_v17 = vpop.xlane.xlu0 %1187 }
 0xc44   :  { %2232 = vpow2.f32 %v1075_v16  ;;  %v1192_v25 = vsub.f32 %v1180_v13, %v1188_v17 }
 0xc46   :  { %v1194_v20 = vmul.f32 1.442695, %v1192_v25 }
 0xc47   :  { %v1191_v27 = vpop.xlane.xlu1 %1190 }
 0xc48   :  { %2234 = vpow2.f32 %v1194_v20  ;;  %v1193_v28 = vsub.f32 %v1183_v54, %v1191_v27 }
 0xc4a   :  { %v1196_v34 = vmul.f32 1.442695, %v1193_v28 }
 0xc4b   :  { %v1309_v31 = vpop.xlane.xlu0 %1308 }
 0xc4c   :  { %v1313_v33 = vsub.f32 %v1301_v58, %v1309_v31  ;;  %2236 = vpow2.f32 %v1196_v34 }
 0xc4d   :  { %v2231_v21 = vpop.eup %2230 }
 0xc4e   :  { %v1077_v22 = vsel %vm179_vm3, %v2231_v21, 0.0  ;;  %v1315_v38 = vmul.f32 1.442695, %v1313_v33 }
 0xc4f   :  { %1078 = vadd.xlane.f32.xlu0 %v1077_v22  ;;  %v1312_v32 = vpop.xlane.xlu1 %1311 }
 0xc50   :  { %v1314_v35 = vsub.f32 %v1304_v62, %v1312_v32  ;;  %2238 = vpow2.f32 %v1315_v38  ;;  %v2182_v32 = vld [vmem:[#allocation2 + $0x68] sm:$0xff]  }
 0xc51   :  { %v2233_v29 = vpop.eup %2232  ;;  %2093 = vmatpush3.bf16.msra.mxu0 %v2182_v32 }
 0xc52   :  { %v1080_v23 = vsel %vm179_vm3, %v2233_v29, 0.0  ;;  %v1317_v40 = vmul.f32 1.442695, %v1314_v35  ;;  %2094 = vmatprep.subr.bf16.mxu0 %v2317_v0 }
 0xc53   :  { %1081 = vadd.xlane.f32.xlu1 %v1080_v23  ;;  %v1430_v36 = vpop.xlane.xlu0 %1429 }
 0xc54   :  { %v1434_v39 = vsub.f32 %v1422_v5, %v1430_v36  ;;  %2240 = vpow2.f32 %v1317_v40 }
 0xc55   :  { %v2619_v24 = vpop.eup %2234 }
 0xc56   :  { %v1198_v26 = vsel %vm179_vm3, %v2619_v24, 0.0  ;;  %v1436_v42 = vmul.f32 1.442695, %v1434_v39 }
 0xc57   :  { %1199 = vadd.xlane.f32.xlu0 %v1198_v26  ;;  %v1433_v37 = vpop.xlane.xlu1 %1432 }
 0xc58   :  { %v1435_v41 = vsub.f32 %v1425_v8, %v1433_v37  ;;  %2242 = vpow2.f32 %v1436_v42  ;;  %v2183_v37 = vld [vmem:[#allocation2 + $0x60] sm:$0xff]  }
 0xc59   :  { %v2237_v44 = vpop.eup %2236  ;;  %2095 = vmatpush3.bf16.msra.mxu0 %v2183_v37 }
 0xc5a   :  { %v1438_v43 = vmul.f32 1.442695, %v1435_v41  ;;  %v1201_v46 = vsel %vm179_vm3, %v2237_v44, 0.0  ;;  %2108 = vmatprep.subr.bf16.mxu0 %v2317_v0 }
 0xc5c   :  { %2244 = vpow2.f32 %v1438_v43 }
 0xc5d   :  { %v2239_v45 = vpop.eup %2238 }
 0xc5e   :  { %v1319_v49 = vsel %vm179_vm3, %v2239_v45, 0.0 }
 0xc61   :  { %v2241_v47 = vpop.eup %2240 }
 0xc62   :  { %v1322_v50 = vsel %vm179_vm3, %v2241_v47, 0.0 }
 0xc64   :  { %1209 = vrot.lane.b32.xlu1 %v2564_v30, %s2326_s0 }
 0xc65   :  { %v2243_v48 = vpop.eup %2242 }
 0xc66   :  { %v1440_v51 = vsel %vm179_vm3, %v2243_v48, 0.0 }
 0xc69   :  { %v2245_v13 = vpop.eup %2244 }
 0xc6a   :  { %v1443_v52 = vsel %vm179_vm3, %v2245_v13, 0.0 }
 0xc6d   :  { %1088 = vrot.lane.b32.xlu0 %v2564_v30, %s2315_s18 }
 0xc88   :  { %1202 = vadd.xlane.f32.xlu1 %v1201_v46 }
 0xc8c   :  { %1320 = vadd.xlane.f32.xlu0 %v1319_v49  ;;  %1323 = vadd.xlane.f32.xlu1 %v1322_v50 }
 0xc90   :  { %1441 = vadd.xlane.f32.xlu0 %v1440_v51  ;;  %1444 = vadd.xlane.f32.xlu1 %v1443_v52 }
 0xca1   :  { %1330 = vrot.lane.b32.xlu1 %v2564_v30, %s2327_s11 }
 0xca6   :  { %1451 = vrot.lane.b32.xlu0 %v2564_v30, %s2328_s12 }
 0xcd8   :  { %v1079_v53 = vpop.xlane.xlu0 %1078 }
 0xcd9   :  { %2246 = vrcp.f32 %v1079_v53 }
 0xcdc   :  { %v1082_v54 = vpop.xlane.xlu1 %1081 }
 0xcdd   :  { %2248 = vrcp.f32 %v1082_v54 }
 0xce0   :  { %v1200_v55 = vpop.xlane.xlu0 %1199  ;;  %v1210_v62 = vpop.permute.xlu1 %1209 }
 0xce1   :  { %2250 = vrcp.f32 %v1200_v55 }
 0xce4   :  { %v1089_v56 = vpop.permute.xlu0 %1088 }
 0xce5   :  { %2051 = vmatpush3.bf16.msra.mxu1 %v1089_v56 }
 0xce6   :  { %2062 = vmatprep.subr.bf16.mxu1 %v2317_v0  ;;  %v2247_v57 = vpop.eup %2246 }
 0xce7   :  { %v1085_v59 = vmul.f32 %v2247_v57, %v2231_v21 }
 0xcea   :  { %v2249_v58 = vpop.eup %2248 }
 0xceb   :  { %v1086_v60 = vmul.f32 %v2249_v58, %v2233_v29 }
 0xced   :  { %v1087_v61 = vpack.c.bf16 %v1086_v60, %v1085_v59 }
 0xcee   :  { %v2251_v6 = vpop.eup %2250 }
 0xcef   :  { %2053 = vmatmul.mubr.msk.bf16.vlgmr.msra.gmra.mxu1 %vm179_vm3, %v1087_v61  ;;  %v1206_v7 = vmul.f32 %v2251_v6, %v2619_v24  ;;  %v1874_v61 = vld [vmem:[%s2713_s3 + $0x9] ss:$0 sm:$0xff] }
 0xcf0   :  { %2063 = vmatpush3.bf16.msra.mxu1 %v1210_v62  ;;  %2064 = vmatprep.mubr.msk.bf16.mxu1 %vm2318_vm0, %v2317_v0 }
 0xcf1   :  { %2074 = vmatprep.subr.bf16.mxu1 %v2317_v0 }
 0xd11   :  { %v1203_v30 = vpop.xlane.xlu1 %1202 }
 0xd12   :  { %2252 = vrcp.f32 %v1203_v30 }
 0xd15   :  { %v1321_v63 = vpop.xlane.xlu0 %1320  ;;  %v1324_v1 = vpop.xlane.xlu1 %1323 }
 0xd16   :  { %2254 = vrcp.f32 %v1321_v63 }
 0xd17   :  { %2256 = vrcp.f32 %v1324_v1 }
 0xd19   :  { %v1442_v2 = vpop.xlane.xlu0 %1441  ;;  %v1445_v5 = vpop.xlane.xlu1 %1444 }
 0xd1a   :  { %2258 = vrcp.f32 %v1442_v2 }
 0xd1b   :  { %2260 = vrcp.f32 %v1445_v5 }
 0xd1d   :  { %v1331_v11 = vpop.permute.xlu1 %1330  ;;  %v1452_v25 = vpop.permute.xlu0 %1451 }
 0xd1f   :  { %v2253_v3 = vpop.eup %2252 }
 0xd20   :  { %v1207_v8 = vmul.f32 %v2253_v3, %v2237_v44 }
 0xd22   :  { %v1208_v9 = vpack.c.bf16 %v1207_v8, %v1206_v7 }
 0xd23   :  { %v2255_v4 = vpop.eup %2254 }
 0xd24   :  { %v2257_v10 = vpop.eup %2256  ;;  %2065 = vmatmul.mubr.msk.bf16.vlgmr.msra.gmra.mxu1 %vm179_vm3, %v1208_v9  ;;  %v1327_v12 = vmul.f32 %v2255_v4, %v2239_v45 }
 0xd25   :  { %2075 = vmatpush3.bf16.msra.mxu1 %v1331_v11  ;;  %2076 = vmatprep.mubr.msk.bf16.mxu1 %vm2318_vm0, %v2317_v0  ;;  %v1328_v14 = vmul.f32 %v2257_v10, %v2241_v47 }
 0xd26   :  { %2086 = vmatprep.subr.bf16.mxu1 %v2317_v0 }
 0xd27   :  { %v2259_v15 = vpop.eup %2258  ;;  %v1329_v16 = vpack.c.bf16 %v1328_v14, %v1327_v12 }
 0xd28   :  { %v2261_v17 = vpop.eup %2260  ;;  %v1448_v20 = vmul.f32 %v2259_v15, %v2243_v48 }
 0xd29   :  { %v1449_v21 = vmul.f32 %v2261_v17, %v2245_v13 }
 0xd2b   :  { %v1450_v22 = vpack.c.bf16 %v1449_v21, %v1448_v20  ;;  %v2186_v20 = vld [vmem:[#allocation2 + $0x98] sm:$0xff]  }
 0xd2c   :  { %2077 = vmatmul.mubr.msk.bf16.vlgmr.msra.gmra.mxu1 %vm179_vm3, %v1329_v16 }
 0xd2d   :  { %2087 = vmatpush3.bf16.msra.mxu1 %v1452_v25  ;;  %2088 = vmatprep.mubr.msk.bf16.mxu1 %vm2318_vm0, %v2317_v0  ;;  %v2184_v25 = vld [vmem:[#allocation2 + $0x78] sm:$0xff]  }
 0xd2e   :  { %2100 = vmatprep.subr.bf16.mxu1 %v2317_v0 }
 0xd34   :  { %2089 = vmatmul.mubr.msk.bf16.vlgmr.msra.gmra.mxu1 %vm179_vm3, %v1450_v22 }
 0xd35   :  { %2104 = vmatprep.mubr.msk.bf16.mxu1 %vm2318_vm0, %v2317_v0  ;;  %2101 = vmatpush3.bf16.msra.mxu1 %v2184_v25 }
 0xd36   :  { %2102 = vmatprep.subr.bf16.mxu1 %v2317_v0 }
 0xdaf   :  { %v1128_v29 = vpop.f32.mrf.mxu1 }
 0xdb1   :  { %v2054_v23 = vpop.f32.mrf.mxu1 }
 0xdb3   :  { %v1131_v24 = vpop.f32.mrf.mxu1 }
 0xdb5   :  { %v2055_v26 = vpop.f32.mrf.mxu1 }
 0xde4   :  { %v1249_v27 = vpop.f32.mrf.mxu1 }
 0xde6   :  { %v2066_v28 = vpop.f32.mrf.mxu1 }
 0xde8   :  { %v1252_v31 = vpop.f32.mrf.mxu1 }
 0xde9   :  { %v2155_v33 = vpack.i.bf16 %v1252_v31, %v1249_v27  ;;  %v1878_v31 = vld [vmem:[%s2713_s3 + $0xa] ss:$0 sm:$0xff] }
 0xdea   :  { %v2067_v34 = vpop.f32.mrf.mxu1 }
 0xdeb   :  { %2156 = vrot.lane.b32.xlu1 %v2155_v33, %s2329_s13 }
 0xdec   :  { %v1370_v35 = vpop.f32.mrf.mxu1 }
 0xdee   :  { %v2078_v36 = vpop.f32.mrf.mxu1 }
 0xdf0   :  { %v1373_v38 = vpop.f32.mrf.mxu1 }
 0xdf1   :  { %v2160_v39 = vpack.i.bf16 %v1373_v38, %v1370_v35  ;;  %v1879_v35 = vld [vmem:[%s2713_s3 + $0xb] ss:$0 sm:$0xff] }
 0xdf2   :  { %v2079_v40 = vpop.f32.mrf.mxu1 }
 0xdf3   :  { %2161 = vrot.lane.b32.xlu0 %v2160_v39, %s2330_s14  ;;  %v2187_v40 = vld [vmem:[#allocation2 + $0x90] sm:$0xff]  }
 0xdf4   :  { %v1491_v41 = vpop.f32.mrf.mxu1 }
 0xdf6   :  { %v2090_v42 = vpop.f32.mrf.mxu1 }
 0xdf7   :  { %v2189_v42 = vld [vmem:[#allocation2 + $0x80] sm:$0xff]  }
 0xdf8   :  { %v1494_v43 = vpop.f32.mrf.mxu1 }
 0xdf9   :  { %v2165_v44 = vpack.i.bf16 %v1494_v43, %v1491_v41  ;;  %v2188_v41 = vld [vmem:[#allocation2 + $0x88] sm:$0xff]  }
 0xdfa   :  { %v2091_v45 = vpop.f32.mrf.mxu1  ;;  %v1880_v43 = vld [vmem:[%s2713_s3 + $0xc] ss:$0 sm:$0xff] }
 0xdfb   :  { %2166 = vrot.lane.b32.xlu1 %v2165_v44, %s2331_s15 }
 0xe5d   :  { %v2157_v46 = vpop.permute.xlu1 %2156 }
 0xe5e   :  { %v2159_v48 = vunpack.i.h.bf16 %v2157_v46  ;;  %v2158_v49 = vunpack.i.l.bf16 %v2157_v46 }
 0xe60   :  { %v1523_v52 = vsel %vm131_vm2, %v1131_v24, %v2159_v48  ;;  %v1522_v53 = vsel %vm131_vm2, %v1128_v29, %v2158_v49 }
 0xe65   :  { %v2162_v47 = vpop.permute.xlu0 %2161 }
 0xe66   :  { %v2164_v50 = vunpack.i.h.bf16 %v2162_v47  ;;  %v2163_v13 = vunpack.i.l.bf16 %v2162_v47 }
 0xe68   :  { %v1525_v56 = vsel %vm179_vm3, %v1523_v52, %v2164_v50  ;;  %v1524_v57 = vsel %vm179_vm3, %v1522_v53, %v2163_v13 }
 0xe6d   :  { %v2167_v51 = vpop.permute.xlu1 %2166 }
 0xe6e   :  { %v2169_v54 = vunpack.i.h.bf16 %v2167_v51  ;;  %v2168_v55 = vunpack.i.l.bf16 %v2167_v51 }
 0xe70   :  { %v1527_v58 = vsel %vm641_vm4, %v1525_v56, %v2169_v54  ;;  %v1526_v59 = vsel %vm641_vm4, %v1524_v57, %v2168_v55 }
 0xe71   :  { %v1528_v60 = vpack.c.bf16 %v1527_v58, %v1526_v59 }
 0xe73   :  { %2097 = vmatmul.mubr.msk.bf16.vlgmr.msra.gmra.mxu0 %vm82_vm1, %v1528_v60 }
 0xe74   :  { %2116 = vmatprep.mubr.msk.bf16.mxu0 %vm2318_vm0, %v2317_v0  ;;  %2109 = vmatpush3.bf16.msra.mxu0 %v2186_v20 }
 0xe75   :  { %2110 = vmatprep.subr.bf16.mxu0 %v2317_v0 }
 0xe78   :  { %2111 = vmatpush3.bf16.msra.mxu0 %v2187_v40 }
 0xe79   :  { %2112 = vmatprep.subr.bf16.mxu0 %v2317_v0 }
 0xe7c   :  { %2113 = vmatpush3.bf16.msra.mxu0 %v2188_v41 }
 0xe7d   :  { %2114 = vmatprep.subr.bf16.mxu0 %v2317_v0  ;;  %v1884_v0 = vld [vmem:[%s2713_s3 + $0xd] ss:$0 sm:$0xff] }
 0xe80   :  { %2115 = vmatpush3.bf16.msra.mxu0 %v2189_v42 }
 0xf33   :  { %v1582_v62 = vpop.f32.mrf.mxu0 }
 0xf34   :  { %v1583_v30 = vadd.f32 %v1874_v61, %v1582_v62 }
 0xf35   :  { %v2098_v63 = vpop.f32.mrf.mxu0 }
 0xf36   :  { %v1589_v1 = vadd.f32 %v1583_v30, %v2552_v18 }
 0xf37   :  { %v1585_v2 = vpop.f32.mrf.mxu0 }
 0xf38   :  { %v1586_v5 = vadd.f32 %v1874_v61, %v1585_v2  ;;  %v1591_v6 = vsel %vm82_vm1, %v1589_v1, 0.0 }
 0xf39   :  { %1592 = vadd.xlane.f32.xlu0 %v1591_v6  ;;  %v2099_v3 = vpop.f32.mrf.mxu0 }
 0xf3a   :  { %v1590_v7 = vadd.f32 %v1586_v5, %v2554_v19  ;;  %v2185_v19 = vld [vmem:[#allocation2 + $0x70] sm:$0xff]  }
 0xf3b   :  { %2103 = vmatpush3.bf16.msra.mxu1 %v2185_v19 }
 0xf3c   :  { %v1594_v8 = vsel %vm82_vm1, %v1590_v7, 0.0 }
 0xf3d   :  { %1595 = vadd.xlane.f32.xlu1 %v1594_v8 }
 0xfc2   :  { %v1593_v9 = vpop.xlane.xlu0 %1592 }
 0xfc3   :  { %v1597_v4 = vmul.f32 0.03125, %v1593_v9 }
 0xfc5   :  { %v1599_v10 = vsub.f32 %v1589_v1, %v1597_v4 }
 0xfc6   :  { %v1596_v11 = vpop.xlane.xlu1 %1595 }
 0xfc7   :  { %v1598_v12 = vmul.f32 0.03125, %v1596_v11  ;;  %v1601_v14 = vmul.f32 %v1599_v10, %v1599_v10 }
 0xfc9   :  { %v1600_v15 = vsub.f32 %v1590_v7, %v1598_v12  ;;  %v1603_v18 = vsel %vm82_vm1, %v1601_v14, 0.0 }
 0xfca   :  { %1604 = vadd.xlane.f32.xlu0 %v1603_v18  ;;  %v1890_v18 = vld [vmem:[%s2713_s3 + $0xe] ss:$0 sm:$0xff] }
 0xfcb   :  { %v1602_v16 = vmul.f32 %v1600_v15, %v1600_v15 }
 0xfcd   :  { %v1606_v17 = vsel %vm82_vm1, %v1602_v16, 0.0 }
 0xfce   :  { %1607 = vadd.xlane.f32.xlu0 %v1606_v17  ;;  %v1891_v17 = vld [vmem:[%s2713_s3 + $0xf] ss:$0 sm:$0xff] }
0x1053   :  { %v1605_v21 = vpop.xlane.xlu0 %1604 }
0x1054   :  { %v1609_v22 = vmul.f32 0.03125, %v1605_v21 }
0x1056   :  { %v1611_v29 = vadd.f32 1e-05, %v1609_v22 }
0x1057   :  { %v1608_v23 = vpop.xlane.xlu0 %1607 }
0x1058   :  { %2262 = vrsqrt.f32 %v1611_v29  ;;  %v1610_v24 = vmul.f32 0.03125, %v1608_v23 }
0x105a   :  { %v1612_v26 = vadd.f32 1e-05, %v1610_v24 }
0x105c   :  { %2264 = vrsqrt.f32 %v1612_v26 }
0x1065   :  { %v2263_v27 = vpop.eup %2262 }
0x1066   :  { %v1615_v28 = vmul.f32 %v2263_v27, %v1599_v10 }
0x1068   :  { %v1621_v34 = vmul.f32 %v1878_v31, %v1615_v28 }
0x1069   :  { %v2265_v32 = vpop.eup %2264 }
0x106a   :  { %v1616_v33 = vmul.f32 %v2265_v32, %v1600_v15  ;;  %v1627_v37 = vadd.f32 %v1879_v35, %v1621_v34 }
0x106c   :  { %v1622_v36 = vmul.f32 %v1878_v31, %v1616_v33 }
0x106e   :  { %v1628_v38 = vadd.f32 %v1879_v35, %v1622_v36 }
0x1070   :  { %v1629_v39 = vpack.c.bf16 %v1628_v38, %v1627_v37 }
0x1072   :  { %2105 = vmatmul.mubr.msk.bf16.vlgmr.msra.gmra.mxu1 %vm82_vm1, %v1629_v39 }
0x1132   :  { %v1683_v44 = vpop.f32.mrf.mxu1 }
0x1133   :  { %v1684_v46 = vadd.f32 %v1880_v43, %v1683_v44 }
0x1134   :  { %v2106_v45 = vpop.f32.mrf.mxu1 }
0x1135   :  { %v1690_v50 = vmax.f32 %v1684_v46, 0.0 }
0x1136   :  { %v1686_v47 = vpop.f32.mrf.mxu1 }
0x1137   :  { %v1687_v48 = vadd.f32 %v1880_v43, %v1686_v47 }
0x1138   :  { %v2107_v49 = vpop.f32.mrf.mxu1 }
0x1139   :  { %v1691_v13 = vmax.f32 %v1687_v48, 0.0 }
0x113b   :  { %v1692_v51 = vpack.c.bf16 %v1691_v13, %v1690_v50 }
0x113d   :  { %2117 = vmatmul.mubr.msk.bf16.vlgmr.msra.gmra.mxu0 %vm838_vm5, %v1692_v51 }
0x11fd   :  { %v1758_v52 = vpop.f32.mrf.mxu0 }
0x11fe   :  { %v1759_v53 = vadd.f32 %v1884_v0, %v1758_v52 }
0x11ff   :  { %v2118_v54 = vpop.f32.mrf.mxu0 }
0x1200   :  { %v1765_v55 = vadd.f32 %v1759_v53, %v1627_v37 }
0x1201   :  { %v1761_v56 = vpop.f32.mrf.mxu0 }
0x1202   :  { %v1762_v57 = vadd.f32 %v1884_v0, %v1761_v56  ;;  %v1767_v58 = vsel %vm82_vm1, %v1765_v55, 0.0 }
0x1203   :  { %1768 = vadd.xlane.f32.xlu1 %v1767_v58  ;;  %v2119_v59 = vpop.f32.mrf.mxu0 }
0x1204   :  { %v1766_v60 = vadd.f32 %v1762_v57, %v1628_v38 }
0x1206   :  { %v1770_v61 = vsel %vm82_vm1, %v1766_v60, 0.0 }
0x1207   :  { %1771 = vadd.xlane.f32.xlu0 %v1770_v61 }
0x128c   :  { %v1769_v62 = vpop.xlane.xlu1 %1768 }
0x128d   :  { %v1773_v30 = vmul.f32 0.03125, %v1769_v62 }
0x128f   :  { %v1775_v63 = vsub.f32 %v1765_v55, %v1773_v30 }
0x1290   :  { %v1772_v1 = vpop.xlane.xlu0 %1771 }
0x1291   :  { %v1774_v2 = vmul.f32 0.03125, %v1772_v1  ;;  %v1777_v5 = vmul.f32 %v1775_v63, %v1775_v63 }
0x1293   :  { %v1776_v6 = vsub.f32 %v1766_v60, %v1774_v2  ;;  %v1779_v3 = vsel %vm82_vm1, %v1777_v5, 0.0 }
0x1294   :  { %1780 = vadd.xlane.f32.xlu1 %v1779_v3 }
0x1295   :  { %v1778_v7 = vmul.f32 %v1776_v6, %v1776_v6 }
0x1297   :  { %v1782_v8 = vsel %vm82_vm1, %v1778_v7, 0.0 }
0x1298   :  { %1783 = vadd.xlane.f32.xlu0 %v1782_v8 }
0x131d   :  { %v1781_v9 = vpop.xlane.xlu1 %1780 }
0x131e   :  { %v1785_v4 = vmul.f32 0.03125, %v1781_v9 }
0x1320   :  { %v1787_v10 = vadd.f32 1e-05, %v1785_v4 }
0x1321   :  { %v1784_v11 = vpop.xlane.xlu0 %1783 }
0x1322   :  { %2266 = vrsqrt.f32 %v1787_v10  ;;  %v1786_v12 = vmul.f32 0.03125, %v1784_v11 }
0x1324   :  { %v1788_v14 = vadd.f32 1e-05, %v1786_v12 }
0x1326   :  { %2268 = vrsqrt.f32 %v1788_v14 }
0x132f   :  { %v2267_v15 = vpop.eup %2266 }
0x1330   :  { %v1791_v16 = vmul.f32 %v2267_v15, %v1775_v63 }
0x1332   :  { %v1797_v25 = vmul.f32 %v1890_v18, %v1791_v16 }
0x1333   :  { %v2269_v19 = vpop.eup %2268 }
0x1334   :  { %v1792_v20 = vmul.f32 %v2269_v19, %v1776_v6  ;;  %v1803_v21 = vadd.f32 %v1891_v17, %v1797_v25 }
0x1336   :  { %v1798_v22 = vmul.f32 %v1890_v18, %v1792_v20  ;;  %1805 = vst.msk [vmem:[#allocation5] sm:$0xff] %vm82_vm1, %v1803_v21 }
0x1338   :  { %v1804_v29 = vadd.f32 %v1891_v17, %v1798_v22 }
0x133a   :  { %1806 = vst.msk [vmem:[#allocation5 + $0x8] sm:$0xff] %vm82_vm1, %v1804_v29 }
0x133b   :  { %2301 = shalt.err (!%p2298_p9)
}
0x133c   :  { %s2333_s3 = smov 128  }
0x133d   :  { %1818 = dma.vmem_to_hbm [thread:$0]  %s1813_s20, 256, %s2714_s4, [#allocation4], %s2333_s3, %s2333_s3, %s2329_s13  }
0x133e   :  { %2312 = dma.done.wait [#allocation4], 256  }
0x133f   :  { %2313 = vsyncadd [#allocation4], 4294967040 }
0x1340   :  { %1822 = vsyncpa [#allocation3], 1 }
0x1341   :  { %1823 = vsyncpa [#allocation4], 1 }

</bundles_post_ra>
